<compile_context>
chip_gen: v7x
topology: tpu7x:2x2x1
jax: 0.10.0
libtpu: 0.0.40
codegen_flags: <defaults>
</compile_context>

<pallas_src>
import functools
import math

import jax
import jax.numpy as jnp
from jax.experimental import pallas as pl
from jax.experimental.pallas import tpu as pltpu


def _tree_gru_kernel(tidx_ref, h_ref, rx_ref, zwx_ref,
                     wh_ref, bh_ref,          # fused [wrh | wk q_s^T], [brh | bk q_s^T]
                     wzw_ref, bzw_ref,        # block-diag [wzh, wwh], [bzh | bwh]
                     out_ref,
                     m_sc, l_sc, hsum_sc, rhsum_sc,
                     *, hidden_size):
    f32 = jnp.float32
    bf16 = jnp.bfloat16
    H = hidden_size
    P = out_ref.shape[0]
    TN = h_ref.shape[0]
    step = pl.program_id(0)

    @pl.when(step == 0)
    def _init():
        # Finite sentinel (not -inf) keeps alpha = exp(m_prev - m_new) finite
        # even for parents with no children seen yet.
        m_sc[...] = jnp.full_like(m_sc, -1e30)
        l_sc[...] = jnp.zeros_like(l_sc)
        hsum_sc[...] = jnp.zeros_like(hsum_sc)
        rhsum_sc[...] = jnp.zeros_like(rhsum_sc)

    h_bf = h_ref[...]                                            # (TN, H) bf16

    # One fused MXU pass per tile: [rpre | scores] ; rpre is lane-0 aligned.
    hk = jnp.dot(h_bf, wh_ref[...], preferred_element_type=f32) + bh_ref[...]   # (TN, H+P)
    rpre = hk[:, :H]                                             # h@wrh + brh

    # Child-major parent mask, rebuilt from tree_idx (padded rows have id -1 ->
    # never match).  Also the LHS of the rx gather matmul below.
    mask_nt = (jax.lax.broadcasted_iota(jnp.int32, (TN, P), 1)
               == tidx_ref[...])                                 # (TN, P)

    # Scores -> parent-major with a single small transpose per tile.
    # Masked lanes are exactly -1e30, which doubles as the validity tag.
    masked = jnp.transpose(jnp.where(mask_nt, hk[:, H:], -1e30))  # (P, TN)
    valid = masked > -1e29                                        # parent-major mask

    # Online (flash-style) segment softmax.
    m_prev = m_sc[...]
    m_new = jnp.maximum(m_prev, jnp.max(masked, axis=-1, keepdims=True))
    alpha = jnp.exp(m_prev - m_new)                               # (P, 1)
    p = jnp.where(valid, jnp.exp(masked - m_new), 0.0)            # (P, TN)
    l_sc[...] = alpha * l_sc[...] + jnp.sum(p, axis=-1, keepdims=True)
    hsum_sc[...] = alpha * hsum_sc[...] + jnp.dot(p.astype(bf16), h_bf,
                                                  preferred_element_type=f32)
    m_sc[...] = m_new

    # Reset gate: rx gathered to children via the child-major mask matmul
    # (no per-tile transpose), then running segment sum of r*h.
    rx_rep = jnp.dot(mask_nt.astype(bf16), rx_ref[...],
                     preferred_element_type=f32)                  # (TN, H)
    r = jax.nn.sigmoid(rpre + rx_rep)                             # f32
    rhsum_sc[...] += jnp.dot(valid.astype(bf16), (r * h_bf).astype(bf16),
                             preferred_element_type=f32)          # (P, H)

    @pl.when(step == pl.num_programs(0) - 1)
    def _finalize():
        inv_l = pl.reciprocal(jnp.maximum(l_sc[...], 1e-30), approx=True)
        h_sum = hsum_sc[...] * inv_l                              # (P, H)
        # Fused finalize matmul: [h_sum | rhsum] @ blockdiag(wzh, wwh).
        gin = jnp.concatenate([h_sum, rhsum_sc[...]], axis=1).astype(bf16)   # (P, 2H)
        g = (jnp.dot(gin, wzw_ref[...], preferred_element_type=f32)
             + bzw_ref[...] + zwx_ref[...])                       # (P, 2H)
        z = jax.nn.sigmoid(g[:, :H])
        h_hat = jnp.tanh(g[:, H:])
        out_ref[...] = ((1.0 - z) * h_sum + z * h_hat).astype(out_ref.dtype)


def _fuse_params(params, x):
    """Per-call fused operands, computed once in XLA (off the kernel critical path)."""
    f32, bf16 = jnp.float32, jnp.bfloat16
    H = params["wzh"].shape[0]
    K = params["wk"].shape[1]
    scale = 1.0 / math.sqrt(K)

    # Fold the attention query into the h-side matmul:
    #   score[n, p] = (h[n] @ wk + bk) . q_scaled[p]
    #              = h[n] @ (wk @ q_scaled^T)[:, p] + (bk @ q_scaled^T)[0, p]
    q_s = (x @ params["wq"] + params["bq"]) * scale               # (P, K) f32
    score_w = params["wk"] @ q_s.T                                # (H, P)
    score_b = params["bk"] @ q_s.T                                # (1, P)
    w_h = jnp.concatenate([params["wrh"], score_w], axis=1).astype(bf16)   # (H, H+P)
    b_h = jnp.concatenate([params["brh"], score_b], axis=1).astype(f32)    # (1, H+P)

    # x-side projection (zrwx is bias-free in the module).
    zrwx = x @ params["wzrwx"]                                    # (P, 3H)
    zx, rx, wx = zrwx[:, :H], zrwx[:, H:2 * H], zrwx[:, 2 * H:]
    zwx = jnp.concatenate([zx, wx], axis=1).astype(f32)           # (P, 2H) finalize adds
    rx_bf = rx.astype(bf16)                                       # (P, H)  per-tile matmul RHS

    # Block-diagonal fusion of the two finalize matmuls.
    w_zw = jnp.zeros((2 * H, 2 * H), f32)
    w_zw = (w_zw.at[:H, :H].set(params["wzh"])
                 .at[H:, H:].set(params["wwh"])).astype(bf16)     # (2H, 2H)
    b_zw = jnp.concatenate([params["bzh"], params["bwh"]], axis=1).astype(f32)  # (1, 2H)
    return w_h, b_h, rx_bf, zwx, w_zw, b_zw


def child_sum_attentive_tree_gru(params, x, h_partial, hx0, tree_idx, hidden_idx,
                                 *, child_tile=256):
    """JAX wrapper: glue (index_copy / padding / weight+query fusion) + one Pallas kernel."""
    H = params["wzh"].shape[0]
    N = int(tree_idx.shape[0])
    P = int(x.shape[0])
    assert child_tile % 128 == 0, "child tile must be a multiple of the 128-lane axis"

    # replace_idx_: base = hx[0] repeated N times, rows hidden_idx <- h_partial.
    h_full = jnp.tile(hx0.reshape(1, H), (N, 1))
    if int(hidden_idx.shape[0]) > 0:
        h_full = h_full.at[hidden_idx].set(h_partial)

    # Pad the child axis to a multiple of the tile.  Padded rows get
    # tree_idx = -1 (never match any parent) and h = 0, so they contribute
    # nothing to any segment.
    n_pad = pl.cdiv(N, child_tile) * child_tile
    h_pad = jnp.pad(h_full, ((0, n_pad - N), (0, 0))).astype(jnp.bfloat16)
    tidx_col = jnp.pad(tree_idx.astype(jnp.int32), (0, n_pad - N),
                       constant_values=-1).reshape(n_pad, 1)      # child-major column

    w_h, b_h, rx_bf, zwx, w_zw, b_zw = _fuse_params(params, x.astype(jnp.float32))

    grid = (n_pad // child_tile,)
    kernel = functools.partial(_tree_gru_kernel, hidden_size=H)

    def full(arr):  # whole-array block, resident across all grid steps
        return pl.BlockSpec(arr.shape, lambda k: (0,) * arr.ndim)

    return pl.pallas_call(
        kernel,
        out_shape=jax.ShapeDtypeStruct((P, H), jnp.float32),
        grid_spec=pltpu.PrefetchScalarGridSpec(
            num_scalar_prefetch=0,
            grid=grid,
            in_specs=[
                pl.BlockSpec((child_tile, 1), lambda k: (k, 0)),   # tree_idx column tile
                pl.BlockSpec((child_tile, H), lambda k: (k, 0)),   # h tile
                full(rx_bf), full(zwx),
                full(w_h), full(b_h),
                full(w_zw), full(b_zw),
            ],
            out_specs=pl.BlockSpec((P, H), lambda k: (0, 0)),
            scratch_shapes=[
                pltpu.VMEM((P, 1), jnp.float32),    # running max
                pltpu.VMEM((P, 1), jnp.float32),    # running denominator
                pltpu.VMEM((P, H), jnp.float32),    # attention-weighted h sum
                pltpu.VMEM((P, H), jnp.float32),    # segment sum of r*h
            ]),
        compiler_params=pltpu.CompilerParams(
            dimension_semantics=("arbitrary",),     # child axis is a reduction
            vmem_limit_bytes=32 * 1024 * 1024),
    )(tidx_col, h_pad, rx_bf, zwx, w_h, b_h, w_zw, b_zw)


def reference(params, x, h_partial, hx0, tree_idx, hidden_idx):
    """Pure-JAX f32 reference mirroring the PyTorch forward (segment ops via jax.ops)."""
    H = params["wzh"].shape[0]
    K = params["wk"].shape[1]
    N = tree_idx.shape[0]
    P = x.shape[0]
    h = jnp.tile(hx0.reshape(1, H), (N, 1)).at[hidden_idx].set(h_partial)

    k = h @ params["wk"] + params["bk"]
    q = x @ params["wq"] + params["bq"]
    scores = jnp.sum(k * q[tree_idx], axis=-1) / math.sqrt(K)
    m = jax.ops.segment_max(scores, tree_idx, num_segments=P)
    e = jnp.exp(scores - m[tree_idx])
    denom = jax.ops.segment_sum(e, tree_idx, num_segments=P)
    attn = e / denom[tree_idx]
    h_sum = jax.ops.segment_sum(attn[:, None] * h, tree_idx, num_segments=P)

    zrwx = x @ params["wzrwx"]
    zx, rx, wx = zrwx[:, :H], zrwx[:, H:2 * H], zrwx[:, 2 * H:]
    z = jax.nn.sigmoid(h_sum @ params["wzh"] + params["bzh"] + zx)
    r = jax.nn.sigmoid(h @ params["wrh"] + params["brh"] + rx[tree_idx])
    rh_sum = jax.ops.segment_sum(r * h, tree_idx, num_segments=P)
    h_hat = jnp.tanh(rh_sum @ params["wwh"] + params["bwh"] + wx)
    return (1.0 - z) * h_sum + z * h_hat


def init_params(key, embedding_size, hidden_size, keys_size, s=0.1):
    """Deterministic synthetic parameters. Weights stored [in, out]; biases [1, out]."""
    ks = jax.random.split(key, 12)
    return {
        # SelfAttention projections
        "wk": s * jax.random.normal(ks[0], (hidden_size, keys_size), jnp.float32),
        "bk": s * jax.random.normal(ks[1], (1, keys_size), jnp.float32),
        "wq": s * jax.random.normal(ks[2], (embedding_size, keys_size), jnp.float32),
        "bq": s * jax.random.normal(ks[3], (1, keys_size), jnp.float32),
        # zrwx : Linear(E, 3H, bias=False)
        "wzrwx": s * jax.random.normal(ks[4], (embedding_size, 3 * hidden_size), jnp.float32),
        # zh, rh, wh : Linear(H, H)
        "wzh": s * jax.random.normal(ks[5], (hidden_size, hidden_size), jnp.float32),
        "bzh": s * jax.random.normal(ks[6], (1, hidden_size), jnp.float32),
        "wrh": s * jax.random.normal(ks[7], (hidden_size, hidden_size), jnp.float32),
        "brh": s * jax.random.normal(ks[8], (1, hidden_size), jnp.float32),
        "wwh": s * jax.random.normal(ks[9], (hidden_size, hidden_size), jnp.float32),
        "bwh": s * jax.random.normal(ks[10], (1, hidden_size), jnp.float32),
    }


if __name__ == "__main__":
    key = jax.random.PRNGKey(0)
    E, H, K = 16, 32, 16
    P = 12                                                  # parents this level

    # Children per parent (grouped consecutively, matching torch.unique_consecutive
    # semantics).  N = 295 -> padded to 512 -> grid of 2 child tiles of 256, with
    # one parent's children straddling the tile boundary and several parents
    # absent from the second tile (exercises the online merge + empty-row guard).
    counts = 22 + (jnp.arange(P) % 7)
    tree_idx = jnp.repeat(jnp.arange(P, dtype=jnp.int32), counts)
    N = int(tree_idx.shape[0])
    hidden_idx = jnp.arange(0, N, 3, dtype=jnp.int32)       # child rows carrying real h

    k0, k1, k2, k3 = jax.random.split(key, 4)
    x = jax.random.normal(k0, (P, E), jnp.float32)          # parent embeddings
    h_partial = jax.random.normal(k1, (int(hidden_idx.shape[0]), H), jnp.float32)
    hx0 = 0.1 * jax.random.normal(k2, (1, H), jnp.float32)  # hx[0]
    params = init_params(k3, E, H, K)

    out = child_sum_attentive_tree_gru(params, x, h_partial, hx0, tree_idx, hidden_idx)
    jax.block_until_ready(out)

    ref = reference(params, x, h_partial, hx0, tree_idx, hidden_idx)
    assert out.shape == (P, H) and out.dtype == jnp.float32
    max_err = float(jnp.max(jnp.abs(out - ref)))
    # Kernel uses bf16 MXU operands with f32 accumulation (plus an approx
    # reciprocal) vs. a pure-f32 reference, so compare at bf16-level tolerance.
    assert jnp.allclose(out, ref, rtol=5e-2, atol=5e-2), \
        f"mismatch vs pure-JAX reference (max abs err {max_err:.4g})"

    print("KERNEL_OK")
</pallas_src>

<mosaic_0001>
module attributes {stable_mosaic.version = 11 : i64} {
  func.func @_tree_gru_kernel(%arg0: i32, %arg1: memref<256x1xi32, #tpu.memory_space<vmem>>, %arg2: memref<256x32xbf16, #tpu.memory_space<vmem>>, %arg3: memref<12x32xbf16, #tpu.memory_space<vmem>>, %arg4: memref<12x64xf32, #tpu.memory_space<vmem>>, %arg5: memref<32x44xbf16, #tpu.memory_space<vmem>>, %arg6: memref<1x44xf32, #tpu.memory_space<vmem>>, %arg7: memref<64x64xbf16, #tpu.memory_space<vmem>>, %arg8: memref<1x64xf32, #tpu.memory_space<vmem>>, %arg9: memref<12x32xf32, #tpu.memory_space<vmem>>, %arg10: memref<12x1xf32, #tpu.memory_space<vmem>>, %arg11: memref<12x1xf32, #tpu.memory_space<vmem>>, %arg12: memref<12x32xf32, #tpu.memory_space<vmem>>, %arg13: memref<12x32xf32, #tpu.memory_space<vmem>>) attributes {dimension_semantics = [#tpu.dimension_semantics<arbitrary>], iteration_bounds = array<i64: 2>, scalar_prefetch = 0 : i64, scratch_operands = 4 : i64, tpu.core_type = #tpu.core_type<tc>, window_params = [{transform_indices = @transform_0, window_bounds = array<i64: 256, 1>}, {transform_indices = @transform_1, window_bounds = array<i64: 256, 32>}, {pipeline_mode = #tpu.pipeline_mode<synchronous>, transform_indices = @transform_2, window_bounds = array<i64: 12, 32>}, {pipeline_mode = #tpu.pipeline_mode<synchronous>, transform_indices = @transform_3, window_bounds = array<i64: 12, 64>}, {pipeline_mode = #tpu.pipeline_mode<synchronous>, transform_indices = @transform_4, window_bounds = array<i64: 32, 44>}, {pipeline_mode = #tpu.pipeline_mode<synchronous>, transform_indices = @transform_5, window_bounds = array<i64: 1, 44>}, {pipeline_mode = #tpu.pipeline_mode<synchronous>, transform_indices = @transform_6, window_bounds = array<i64: 64, 64>}, {pipeline_mode = #tpu.pipeline_mode<synchronous>, transform_indices = @transform_7, window_bounds = array<i64: 1, 64>}, {pipeline_mode = #tpu.pipeline_mode<synchronous>, transform_indices = @transform_8, window_bounds = array<i64: 12, 32>}]} {
    %c0_i32 = arith.constant 0 : i32
    %0 = arith.cmpi eq, %arg0, %c0_i32 : i32
    %1 = arith.extui %0 : i1 to i32
    %c0_i32_0 = arith.constant 0 : i32
    %2 = arith.cmpi ne, %1, %c0_i32_0 : i32
    scf.if %2 {
      %cst_36 = arith.constant -1.000000e+30 : f32
      %69 = vector.broadcast %cst_36 : f32 to vector<12x1xf32>
      %c0_37 = arith.constant 0 : index
      %c0_38 = arith.constant 0 : index
      %70 = vector.load %arg10[%c0_37, %c0_38] : memref<12x1xf32, #tpu.memory_space<vmem>>, vector<12x1xf32>
      tpu.vector_store %arg10[%c0_37, %c0_38], %69 {strides = array<i32>} : memref<12x1xf32, #tpu.memory_space<vmem>>, vector<12x1xf32>,
      %cst_39 = arith.constant 0.000000e+00 : f32
      %71 = vector.broadcast %cst_39 : f32 to vector<12x1xf32>
      %c0_40 = arith.constant 0 : index
      %c0_41 = arith.constant 0 : index
      %72 = vector.load %arg11[%c0_40, %c0_41] : memref<12x1xf32, #tpu.memory_space<vmem>>, vector<12x1xf32>
      tpu.vector_store %arg11[%c0_40, %c0_41], %71 {strides = array<i32>} : memref<12x1xf32, #tpu.memory_space<vmem>>, vector<12x1xf32>,
      %cst_42 = arith.constant 0.000000e+00 : f32
      %73 = vector.broadcast %cst_42 : f32 to vector<12x32xf32>
      %c0_43 = arith.constant 0 : index
      %c0_44 = arith.constant 0 : index
      %74 = vector.load %arg12[%c0_43, %c0_44] : memref<12x32xf32, #tpu.memory_space<vmem>>, vector<12x32xf32>
      tpu.vector_store %arg12[%c0_43, %c0_44], %73 {strides = array<i32>} : memref<12x32xf32, #tpu.memory_space<vmem>>, vector<12x32xf32>,
      %cst_45 = arith.constant 0.000000e+00 : f32
      %75 = vector.broadcast %cst_45 : f32 to vector<12x32xf32>
      %c0_46 = arith.constant 0 : index
      %c0_47 = arith.constant 0 : index
      %76 = vector.load %arg13[%c0_46, %c0_47] : memref<12x32xf32, #tpu.memory_space<vmem>>, vector<12x32xf32>
      tpu.vector_store %arg13[%c0_46, %c0_47], %75 {strides = array<i32>} : memref<12x32xf32, #tpu.memory_space<vmem>>, vector<12x32xf32>,
    } else {
    }
    %c0 = arith.constant 0 : index
    %c0_1 = arith.constant 0 : index
    %3 = vector.load %arg2[%c0, %c0_1] : memref<256x32xbf16, #tpu.memory_space<vmem>>, vector<256x32xbf16>
    %c0_2 = arith.constant 0 : index
    %c0_3 = arith.constant 0 : index
    %4 = vector.load %arg5[%c0_2, %c0_3] : memref<32x44xbf16, #tpu.memory_space<vmem>>, vector<32x44xbf16>
    %cst = arith.constant dense<0.000000e+00> : vector<256x44xf32>
    %5 = tpu.matmul %3, %4, %cst {dimension_numbers = #tpu.dot_dimension_numbers<[1], [0], [0], [1], [0, 0, 1, 1], [], []>} : vector<256x32xbf16>, vector<32x44xbf16>, vector<256x44xf32> -> vector<256x44xf32>
    %c0_4 = arith.constant 0 : index
    %c0_5 = arith.constant 0 : index
    %6 = vector.load %arg6[%c0_4, %c0_5] : memref<1x44xf32, #tpu.memory_space<vmem>>, vector<1x44xf32>
    %7 = vector.broadcast %6 : vector<1x44xf32> to vector<256x44xf32>
    %8 = arith.addf %5, %7 : vector<256x44xf32>
    %9 = vector.extract_strided_slice %8 {offsets = [0, 0], sizes = [256, 32], strides = [1, 1]} : vector<256x44xf32> to vector<256x32xf32>
    %10 = tpu.iota {dimensions = array<i32: 1>} : vector<256x12xi32>
    %c0_6 = arith.constant 0 : index
    %c0_7 = arith.constant 0 : index
    %11 = vector.load %arg1[%c0_6, %c0_7] : memref<256x1xi32, #tpu.memory_space<vmem>>, vector<256x1xi32>
    %12 = vector.broadcast %11 : vector<256x1xi32> to vector<256x12xi32>
    %13 = arith.cmpi eq, %10, %12 : vector<256x12xi32>
    %14 = vector.extract_strided_slice %8 {offsets = [0, 32], sizes = [256, 12], strides = [1, 1]} : vector<256x44xf32> to vector<256x12xf32>
    %cst_8 = arith.constant -1.000000e+30 : f32
    %15 = vector.broadcast %cst_8 : f32 to vector<256x12xf32>
    %16 = arith.select %13, %14, %15 : vector<256x12xi1>, vector<256x12xf32>
    %17 = tpu.transpose %16, [1, 0] : vector<256x12xf32> -> vector<12x256xf32>
    %cst_9 = arith.constant -1.000000e+29 : f32
    %18 = vector.broadcast %cst_9 : f32 to vector<12x256xf32>
    %19 = arith.cmpf ogt, %17, %18 : vector<12x256xf32>
    %c0_10 = arith.constant 0 : index
    %c0_11 = arith.constant 0 : index
    %20 = vector.load %arg10[%c0_10, %c0_11] : memref<12x1xf32, #tpu.memory_space<vmem>>, vector<12x1xf32>
    %cst_12 = arith.constant dense<0xFF800000> : vector<12xf32>
    %21 = vector.multi_reduction <maximumf>, %17, %cst_12 [1] : vector<12x256xf32> to vector<12xf32>
    %22 = vector.shape_cast %21 : vector<12xf32> to vector<12x1xf32>
    %23 = arith.maximumf %20, %22 : vector<12x1xf32>
    %24 = arith.subf %20, %23 : vector<12x1xf32>
    %25 = math.exp %24 : vector<12x1xf32>
    %26 = vector.broadcast %23 : vector<12x1xf32> to vector<12x256xf32>
    %27 = arith.subf %17, %26 : vector<12x256xf32>
    %28 = math.exp %27 : vector<12x256xf32>
    %cst_13 = arith.constant 0.000000e+00 : f32
    %29 = vector.broadcast %cst_13 : f32 to vector<12x256xf32>
    %30 = arith.select %19, %28, %29 : vector<12x256xi1>, vector<12x256xf32>
    %c0_14 = arith.constant 0 : index
    %c0_15 = arith.constant 0 : index
    %31 = vector.load %arg11[%c0_14, %c0_15] : memref<12x1xf32, #tpu.memory_space<vmem>>, vector<12x1xf32>
    %32 = arith.mulf %25, %31 : vector<12x1xf32>
    %cst_16 = arith.constant dense<0.000000e+00> : vector<12xf32>
    %33 = vector.multi_reduction <add>, %30, %cst_16 [1] : vector<12x256xf32> to vector<12xf32>
    %34 = vector.shape_cast %33 : vector<12xf32> to vector<12x1xf32>
    %35 = arith.addf %32, %34 : vector<12x1xf32>
    %c0_17 = arith.constant 0 : index
    %c0_18 = arith.constant 0 : index
    %36 = vector.load %arg11[%c0_17, %c0_18] : memref<12x1xf32, #tpu.memory_space<vmem>>, vector<12x1xf32>
    tpu.vector_store %arg11[%c0_17, %c0_18], %35 {strides = array<i32>} : memref<12x1xf32, #tpu.memory_space<vmem>>, vector<12x1xf32>,
    %c0_19 = arith.constant 0 : index
    %c0_20 = arith.constant 0 : index
    %37 = vector.load %arg12[%c0_19, %c0_20] : memref<12x32xf32, #tpu.memory_space<vmem>>, vector<12x32xf32>
    %38 = vector.broadcast %25 : vector<12x1xf32> to vector<12x32xf32>
    %39 = arith.mulf %38, %37 : vector<12x32xf32>
    %40 = arith.truncf %30 : vector<12x256xf32> to vector<12x256xbf16>
    %cst_21 = arith.constant dense<0.000000e+00> : vector<12x32xf32>
    %41 = tpu.matmul %40, %3, %cst_21 {dimension_numbers = #tpu.dot_dimension_numbers<[1], [0], [0], [1], [0, 0, 1, 1], [], []>} : vector<12x256xbf16>, vector<256x32xbf16>, vector<12x32xf32> -> vector<12x32xf32>
    %42 = arith.addf %39, %41 : vector<12x32xf32>
    %c0_22 = arith.constant 0 : index
    %c0_23 = arith.constant 0 : index
    %43 = vector.load %arg12[%c0_22, %c0_23] : memref<12x32xf32, #tpu.memory_space<vmem>>, vector<12x32xf32>
    tpu.vector_store %arg12[%c0_22, %c0_23], %42 {strides = array<i32>} : memref<12x32xf32, #tpu.memory_space<vmem>>, vector<12x32xf32>,
    %c0_24 = arith.constant 0 : index
    %c0_25 = arith.constant 0 : index
    %44 = vector.load %arg10[%c0_24, %c0_25] : memref<12x1xf32, #tpu.memory_space<vmem>>, vector<12x1xf32>
    tpu.vector_store %arg10[%c0_24, %c0_25], %23 {strides = array<i32>} : memref<12x1xf32, #tpu.memory_space<vmem>>, vector<12x1xf32>,
    %45 = arith.extui %13 : vector<256x12xi1> to vector<256x12xi32>
    %46 = arith.sitofp %45 : vector<256x12xi32> to vector<256x12xf32>
    %47 = arith.truncf %46 : vector<256x12xf32> to vector<256x12xbf16>
    %c0_26 = arith.constant 0 : index
    %c0_27 = arith.constant 0 : index
    %48 = vector.load %arg3[%c0_26, %c0_27] : memref<12x32xbf16, #tpu.memory_space<vmem>>, vector<12x32xbf16>
    %cst_28 = arith.constant dense<0.000000e+00> : vector<256x32xf32>
    %49 = tpu.matmul %47, %48, %cst_28 {dimension_numbers = #tpu.dot_dimension_numbers<[1], [0], [0], [1], [0, 0, 1, 1], [], []>} : vector<256x12xbf16>, vector<12x32xbf16>, vector<256x32xf32> -> vector<256x32xf32>
    %50 = arith.addf %9, %49 : vector<256x32xf32>
    %51 = arith.negf %50 : vector<256x32xf32>
    %52 = math.exp %51 : vector<256x32xf32>
    %cst_29 = arith.constant 1.000000e+00 : f32
    %53 = vector.broadcast %cst_29 : f32 to vector<256x32xf32>
    %54 = arith.addf %53, %52 : vector<256x32xf32>
    %55 = arith.divf %53, %54 : vector<256x32xf32>
    %c0_30 = arith.constant 0 : index
    %c0_31 = arith.constant 0 : index
    %56 = vector.load %arg13[%c0_30, %c0_31] : memref<12x32xf32, #tpu.memory_space<vmem>>, vector<12x32xf32>
    %57 = arith.extui %19 : vector<12x256xi1> to vector<12x256xi32>
    %58 = arith.sitofp %57 : vector<12x256xi32> to vector<12x256xf32>
    %59 = arith.truncf %58 : vector<12x256xf32> to vector<12x256xbf16>
    %60 = arith.extf %3 : vector<256x32xbf16> to vector<256x32xf32>
    %61 = arith.mulf %55, %60 : vector<256x32xf32>
    %62 = arith.truncf %61 : vector<256x32xf32> to vector<256x32xbf16>
    %cst_32 = arith.constant dense<0.000000e+00> : vector<12x32xf32>
    %63 = tpu.matmul %59, %62, %cst_32 {dimension_numbers = #tpu.dot_dimension_numbers<[1], [0], [0], [1], [0, 0, 1, 1], [], []>} : vector<12x256xbf16>, vector<256x32xbf16>, vector<12x32xf32> -> vector<12x32xf32>
    %64 = arith.addf %56, %63 : vector<12x32xf32>
    %c0_33 = arith.constant 0 : index
    %c0_34 = arith.constant 0 : index
    %65 = vector.load %arg13[%c0_33, %c0_34] : memref<12x32xf32, #tpu.memory_space<vmem>>, vector<12x32xf32>
    tpu.vector_store %arg13[%c0_33, %c0_34], %64 {strides = array<i32>} : memref<12x32xf32, #tpu.memory_space<vmem>>, vector<12x32xf32>,
    %c1_i32 = arith.constant 1 : i32
    %66 = arith.cmpi eq, %arg0, %c1_i32 : i32
    %67 = arith.extui %66 : i1 to i32
    %c0_i32_35 = arith.constant 0 : i32
    %68 = arith.cmpi ne, %67, %c0_i32_35 : i32
    scf.if %68 {
      %c0_36 = arith.constant 0 : index
      %c0_37 = arith.constant 0 : index
      %69 = vector.load %arg11[%c0_36, %c0_37] : memref<12x1xf32, #tpu.memory_space<vmem>>, vector<12x1xf32>
      %cst_38 = arith.constant 1.000000e-30 : f32
      %70 = vector.broadcast %cst_38 : f32 to vector<12x1xf32>
      %71 = arith.maximumf %69, %70 : vector<12x1xf32>
      %72 = tpu.reciprocal %71 {approx = true} : vector<12x1xf32> -> vector<12x1xf32>
      %c0_39 = arith.constant 0 : index
      %c0_40 = arith.constant 0 : index
      %73 = vector.load %arg12[%c0_39, %c0_40] : memref<12x32xf32, #tpu.memory_space<vmem>>, vector<12x32xf32>
      %74 = vector.broadcast %72 : vector<12x1xf32> to vector<12x32xf32>
      %75 = arith.mulf %73, %74 : vector<12x32xf32>
      %c0_41 = arith.constant 0 : index
      %c0_42 = arith.constant 0 : index
      %76 = vector.load %arg13[%c0_41, %c0_42] : memref<12x32xf32, #tpu.memory_space<vmem>>, vector<12x32xf32>
      %77 = tpu.concatenate %75, %76 in 1 : vector<12x32xf32>, vector<12x32xf32> -> vector<12x64xf32>
      %78 = arith.truncf %77 : vector<12x64xf32> to vector<12x64xbf16>
      %c0_43 = arith.constant 0 : index
      %c0_44 = arith.constant 0 : index
      %79 = vector.load %arg7[%c0_43, %c0_44] : memref<64x64xbf16, #tpu.memory_space<vmem>>, vector<64x64xbf16>
      %cst_45 = arith.constant dense<0.000000e+00> : vector<12x64xf32>
      %80 = tpu.matmul %78, %79, %cst_45 {dimension_numbers = #tpu.dot_dimension_numbers<[1], [0], [0], [1], [0, 0, 1, 1], [], []>} : vector<12x64xbf16>, vector<64x64xbf16>, vector<12x64xf32> -> vector<12x64xf32>
      %c0_46 = arith.constant 0 : index
      %c0_47 = arith.constant 0 : index
      %81 = vector.load %arg8[%c0_46, %c0_47] : memref<1x64xf32, #tpu.memory_space<vmem>>, vector<1x64xf32>
      %82 = vector.broadcast %81 : vector<1x64xf32> to vector<12x64xf32>
      %83 = arith.addf %80, %82 : vector<12x64xf32>
      %c0_48 = arith.constant 0 : index
      %c0_49 = arith.constant 0 : index
      %84 = vector.load %arg4[%c0_48, %c0_49] : memref<12x64xf32, #tpu.memory_space<vmem>>, vector<12x64xf32>
      %85 = arith.addf %83, %84 : vector<12x64xf32>
      %86 = vector.extract_strided_slice %85 {offsets = [0, 0], sizes = [12, 32], strides = [1, 1]} : vector<12x64xf32> to vector<12x32xf32>
      %87 = arith.negf %86 : vector<12x32xf32>
      %88 = math.exp %87 : vector<12x32xf32>
      %cst_50 = arith.constant 1.000000e+00 : f32
      %89 = vector.broadcast %cst_50 : f32 to vector<12x32xf32>
      %90 = arith.addf %89, %88 : vector<12x32xf32>
      %91 = arith.divf %89, %90 : vector<12x32xf32>
      %92 = vector.extract_strided_slice %85 {offsets = [0, 32], sizes = [12, 32], strides = [1, 1]} : vector<12x64xf32> to vector<12x32xf32>
      %93 = math.tanh %92 : vector<12x32xf32>
      %cst_51 = arith.constant 1.000000e+00 : f32
      %94 = vector.broadcast %cst_51 : f32 to vector<12x32xf32>
      %95 = arith.subf %94, %91 : vector<12x32xf32>
      %96 = arith.mulf %95, %75 : vector<12x32xf32>
      %97 = arith.mulf %91, %93 : vector<12x32xf32>
      %98 = arith.addf %96, %97 : vector<12x32xf32>
      %c0_52 = arith.constant 0 : index
      %c0_53 = arith.constant 0 : index
      %99 = vector.load %arg9[%c0_52, %c0_53] : memref<12x32xf32, #tpu.memory_space<vmem>>, vector<12x32xf32>
      tpu.vector_store %arg9[%c0_52, %c0_53], %98 {strides = array<i32>} : memref<12x32xf32, #tpu.memory_space<vmem>>, vector<12x32xf32>,
    } else {
    }
    return
  }
  func.func @transform_0(%arg0: i32) -> (i32, i32) {
    %c0_i32 = arith.constant 0 : i32
    %c0_i32_0 = arith.constant 0 : i32
    return %arg0, %c0_i32 : i32, i32
  }
  func.func @transform_1(%arg0: i32) -> (i32, i32) {
    %c0_i32 = arith.constant 0 : i32
    %c0_i32_0 = arith.constant 0 : i32
    return %arg0, %c0_i32 : i32, i32
  }
  func.func @transform_2(%arg0: i32) -> (i32, i32) {
    %c0_i32 = arith.constant 0 : i32
    %c0_i32_0 = arith.constant 0 : i32
    %c0_i32_1 = arith.constant 0 : i32
    return %c0_i32, %c0_i32_0 : i32, i32
  }
  func.func @transform_3(%arg0: i32) -> (i32, i32) {
    %c0_i32 = arith.constant 0 : i32
    %c0_i32_0 = arith.constant 0 : i32
    %c0_i32_1 = arith.constant 0 : i32
    return %c0_i32, %c0_i32_0 : i32, i32
  }
  func.func @transform_4(%arg0: i32) -> (i32, i32) {
    %c0_i32 = arith.constant 0 : i32
    %c0_i32_0 = arith.constant 0 : i32
    %c0_i32_1 = arith.constant 0 : i32
    return %c0_i32, %c0_i32_0 : i32, i32
  }
  func.func @transform_5(%arg0: i32) -> (i32, i32) {
    %c0_i32 = arith.constant 0 : i32
    %c0_i32_0 = arith.constant 0 : i32
    %c0_i32_1 = arith.constant 0 : i32
    return %c0_i32, %c0_i32_0 : i32, i32
  }
  func.func @transform_6(%arg0: i32) -> (i32, i32) {
    %c0_i32 = arith.constant 0 : i32
    %c0_i32_0 = arith.constant 0 : i32
    %c0_i32_1 = arith.constant 0 : i32
    return %c0_i32, %c0_i32_0 : i32, i32
  }
  func.func @transform_7(%arg0: i32) -> (i32, i32) {
    %c0_i32 = arith.constant 0 : i32
    %c0_i32_0 = arith.constant 0 : i32
    %c0_i32_1 = arith.constant 0 : i32
    return %c0_i32, %c0_i32_0 : i32, i32
  }
  func.func @transform_8(%arg0: i32) -> (i32, i32) {
    %c0_i32 = arith.constant 0 : i32
    %c0_i32_0 = arith.constant 0 : i32
    %c0_i32_1 = arith.constant 0 : i32
    return %c0_i32, %c0_i32_0 : i32, i32
  }
}

</mosaic_0001>

<bundles_post_ra>
// kernel: tpu_custom_call.1
= control target key start
LH: loop header
LB: loop body
LE: loop exit
PB: predicated region body
PF: predicated region fallthrough
CT: control target
= control target key end

     0   :  { %13 = vsyncpa [#allocation7], 0  ;;  %s2753_s27 = smov 0   ;;  %s3619_s0 = inlined_call_operand.vmem [shape: s32[512,1], index: 0, kind: input, shape index: {}]   ;;  %s3620_s1 = inlined_call_operand.vmem [shape: bf16[512,32], index: 1, kind: input, shape index: {}]   ;;  %s3621_s2 = inlined_call_operand.vmem [shape: bf16[12,32], index: 2, kind: input, shape index: {}]   ;;  %s3622_s3 = inlined_call_operand.vmem [shape: f32[12,64], index: 3, kind: input, shape index: {}]   ;;  %s3623_s4 = inlined_call_operand.vmem [shape: bf16[32,44], index: 4, kind: input, shape index: {}]   ;;  %s3624_s5 = inlined_call_operand.vmem [shape: f32[1,44], index: 5, kind: input, shape index: {}]   ;;  %s3625_s6 = inlined_call_operand.vmem [shape: bf16[64,64], index: 6, kind: input, shape index: {}]   ;;  %s3626_s7 = inlined_call_operand.vmem [shape: f32[1,64], index: 7, kind: input, shape index: {}]   ;;  %s3627_s8 = inlined_call_operand.hbm [shape: f32[12,32], index: 8, kind: output, shape index: {}]  }
   0x1 LB: > { %s2759_s28 = sadd.s32 4294967295, %s2692_s27   ;;  %p2093_p0 = scmp.ge.s32.totalorder %s2692_s27, 1  ;;  %s2692_s27 = sphi %s2753_s27, %s19_s27  }
   0x2   : > { %p270_p1 = scmp.lt.s32.totalorder %s2692_s27, 3 }
   0x4   : > { %p271_p2 = pnand %p2093_p0, %p270_p1 }
   0x6   : > { %274 = sbr.rel (%p271_p2) target bundleno = 1874 (0x752), region = 52 }
   0xd   : > { %s2094_s29 = sshll.u32 %s2759_s28, 5  ;;  %p2098_p4 = scmp.ne.s32.totalorder %s2759_s28, 0 }
   0xe   : > { %p305_p3 = scmp.lt.s32.totalorder %s2094_s29, 63  ;;  %vm321_vm0 = vcmask (!%p2098_p4), 7168   ;;  %vm323_vm1 = vcmask (!%p2098_p4), 3072   ;;  %v2694_v0 = vmov (!%p2098_p4), -1e+30   ;;  %v2695_v1 = vmov (!%p2098_p4), 0.0  }
   0xf   : > { %320 = sbr.rel (%p2098_p4) target bundleno = 22 (0x16), region = 56  ;;  %322 = vst.msk [vmem:[#allocation2] sm:$0xff] (!%p2098_p4), %vm321_vm0, %v2694_v0  ;;  %325 = vst.msk [vmem:[#allocation3] sm:$0xff] (!%p2098_p4), %vm321_vm0, %v2695_v1  ;;  %vm327_vm2 = vcmask (!%p2098_p4), 261120   ;;  %vm329_vm3 = vcmask (!%p2098_p4), 257024  }
  0x10   : > { %s3755_s29 = smov (!%p305_p3, %s2094_s29), 63  ;;  %324 = vst.msk [vmem:[#allocation2 + $0x8] sm:$0xf] (!%p2098_p4), %vm323_vm1, %v2694_v0  ;;  %326 = vst.msk [vmem:[#allocation3 + $0x8] sm:$0xf] (!%p2098_p4), %vm323_vm1, %v2695_v1 }
  0x11   : > { %s2095_s30 = sshll.u32 %s3755_s29, 3  ;;  %s2097_s9 = sshll.u32 %s3755_s29, 2  ;;  %328 = vst.msk [vmem:[#allocation4] sm:$0xff] (!%p2098_p4), %vm327_vm2, %v2695_v1  ;;  %331 = vst.msk [vmem:[#allocation5] sm:$0xff] (!%p2098_p4), %vm327_vm2, %v2695_v1 }
  0x12   : > { %s2767_s12 = scalar_lea.vmem %s3619_s0, %s2095_s30  ;;  %s2772_s15 = scalar_lea.vmem %s3620_s1, %s2097_s9  ;;  %330 = vst.msk [vmem:[#allocation4 + $0x8] sm:$0xf] (!%p2098_p4), %vm329_vm3, %v2695_v1  ;;  %332 = vst.msk [vmem:[#allocation5 + $0x8] sm:$0xf] (!%p2098_p4), %vm329_vm3, %v2695_v1 }
  0x16 PF: > { %v2439_v2 = vld [vmem:[%s3623_s4] sm:$0xff]   ;;  %v2440_v3 = vld [vmem:[%s3623_s4 + $0x8] sm:$0xff]   ;;  %vm3637_vm4 = vcmask 261120   ;;  %v2696_v5 = vmov 0   ;;  %v337_v7 = vld [vmem:[%s2772_s15 + $0x10] sm:$0xff]   ;;  %v678_v59 = vlaneseq  ;;  %s2697_s22 = smov 96  }
  0x17   : > { %2326 = vmatprep.subr.bf16.mxu0 %v2439_v2  ;;  %v333_v4 = vld [vmem:[%s2772_s15] sm:$0xff]   ;;  %2438 = vset.pattern.permute.xlu1 %v2696_v5  ;;  %v335_v6 = vld [vmem:[%s2772_s15 + $0x8] sm:$0xff]   ;;  %v339_v14 = vld [vmem:[%s2772_s15 + $0x18] sm:$0xff]   ;;  %p2229_p5 = scmp.ne.s32.totalorder %s2759_s28, 1 }
  0x18   : > { %2327 = vmatpush3.bf16.msra.mxu0 %v2439_v2  ;;  %2437 = vset.pattern.permute.xlu0 %v2696_v5  ;;  %v2786_v8 = vld [vmem:[%s2772_s15 + $0x40] sm:$0xff]   ;;  %v681_v9 = vld [vmem:[%s2767_s12 + $0x8] sm:$0xff]  ;;  %v353_v16 = vld [vmem:[%s2772_s15 + $0x50] sm:$0xff]   ;;  %v2871_v61 = vand.u32 127, %v678_v59  ;;  %s2702_s29 = smov (!%p2229_p5), 32   ;;  %s2704_s20 = smov (!%p2229_p5), 96  }
  0x19   : > { %2328 = vmatprep.subr.bf16.mxu0 %v2440_v3  ;;  %2330 = vmatprep.mubr.msk.bf16.mxu0 %vm3637_vm4, %v333_v4  ;;  %v680_v10 = vld [vmem:[%s2767_s12] sm:$0xff]  ;;  %v2791_v11 = vld [vmem:[%s2772_s15 + $0x48] sm:$0xff]   ;;  %v698_v17 = vld [vmem:[%s2767_s12 + $0x90] sm:$0xff] }
  0x1a   : > { %716 = vperm.xlu1 %2438, %v681_v9   ;;  %713 = vperm.xlu0 %2437, %v680_v10   ;;  %v697_v12 = vld [vmem:[%s2767_s12 + $0x88] sm:$0xff]  ;;  %v696_v13 = vld [vmem:[%s2767_s12 + $0x80] sm:$0xff]  ;;  %v682_v18 = vld [vmem:[%s2767_s12 + $0x10] sm:$0xff] }
  0x1b   : > { %2260 = vmatprep.subr.bf16.mxu1 %v2786_v8  ;;  %v341_v15 = vld [vmem:[%s2772_s15 + $0x20] sm:$0xff]   ;;  %v2805_v19 = vld [vmem:[%s2772_s15 + $0x58] sm:$0xff]   ;;  %v343_v22 = vld [vmem:[%s2772_s15 + $0x28] sm:$0xff]  }
  0x1c   : > { %2329 = vmatpush3.bf16.msra.mxu0 %v2440_v3  ;;  %2261 = vmatpush3.bf16.msra.mxu1 %v333_v4  ;;  %v699_v20 = vld [vmem:[%s2767_s12 + $0x98] sm:$0xff]  ;;  %v345_v23 = vld [vmem:[%s2772_s15 + $0x30] sm:$0xff]   ;;  %v357_v24 = vld [vmem:[%s2772_s15 + $0x60] sm:$0xff]  }
  0x1d   : > { %2262 = vmatprep.subr.bf16.mxu1 %v2791_v11  ;;  %v683_v21 = vld [vmem:[%s2767_s12 + $0x18] sm:$0xff]  ;;  %v700_v25 = vld [vmem:[%s2767_s12 + $0xa0] sm:$0xff]  ;;  %v359_v27 = vld [vmem:[%s2772_s15 + $0x68] sm:$0xff]  }
  0x1e   : > { %764 = vperm.xlu1 %2438, %v697_v12   ;;  %761 = vperm.xlu0 %2437, %v696_v13   ;;  %v684_v26 = vld [vmem:[%s2767_s12 + $0x20] sm:$0xff]  ;;  %v701_v28 = vld [vmem:[%s2767_s12 + $0xa8] sm:$0xff]  ;;  %v347_v30 = vld [vmem:[%s2772_s15 + $0x38] sm:$0xff]  }
  0x1f   : > { %2331 = vmatmul.mubr.msk.bf16.vlgmr.msra.gmra.mrb[0].mxu0 %vm3637_vm4, %v335_v6  ;;  %v685_v29 = vld [vmem:[%s2767_s12 + $0x28] sm:$0xff]  ;;  %v361_v31 = vld [vmem:[%s2772_s15 + $0x70] sm:$0xff]   ;;  %v363_v34 = vld [vmem:[%s2772_s15 + $0x78] sm:$0xff]  }
  0x20   : > { %2334 = vmatprep.mubr.msk.bf16.mxu0 %vm3637_vm4, %v337_v7  ;;  %2263 = vmatpush3.bf16.msra.mxu1 %v335_v6  ;;  %v702_v32 = vld [vmem:[%s2767_s12 + $0xb0] sm:$0xff]  ;;  %v703_v35 = vld [vmem:[%s2767_s12 + $0xb8] sm:$0xff]  ;;  %v704_v37 = vld [vmem:[%s2767_s12 + $0xc0] sm:$0xff] }
  0x21   : > { %2264 = vmatprep.subr.bf16.mxu1 %v353_v16  ;;  %v686_v33 = vld [vmem:[%s2767_s12 + $0x30] sm:$0xff]  ;;  %v687_v36 = vld [vmem:[%s2767_s12 + $0x38] sm:$0xff]  ;;  %v688_v38 = vld [vmem:[%s2767_s12 + $0x40] sm:$0xff] }
  0x22   : > { %767 = vperm.xlu1 %2438, %v698_v17   ;;  %719 = vperm.xlu0 %2437, %v682_v18   ;;  %v705_v39 = vld [vmem:[%s2767_s12 + $0xc8] sm:$0xff]  ;;  %v706_v41 = vld [vmem:[%s2767_s12 + $0xd0] sm:$0xff]  ;;  %v707_v43 = vld [vmem:[%s2767_s12 + $0xd8] sm:$0xff] }
  0x23   : > { %v689_v40 = vld [vmem:[%s2767_s12 + $0x48] sm:$0xff]  ;;  %v690_v42 = vld [vmem:[%s2767_s12 + $0x50] sm:$0xff]  ;;  %v691_v44 = vld [vmem:[%s2767_s12 + $0x58] sm:$0xff] }
  0x24   : > { %2265 = vmatpush3.bf16.msra.mxu1 %v337_v7  ;;  %v708_v45 = vld [vmem:[%s2767_s12 + $0xe0] sm:$0xff]  ;;  %v709_v47 = vld [vmem:[%s2767_s12 + $0xe8] sm:$0xff]  ;;  %v710_v49 = vld [vmem:[%s2767_s12 + $0xf0] sm:$0xff] }
  0x25   : > { %2266 = vmatprep.subr.bf16.mxu1 %v2805_v19  ;;  %v692_v46 = vld [vmem:[%s2767_s12 + $0x60] sm:$0xff]  ;;  %v693_v48 = vld [vmem:[%s2767_s12 + $0x68] sm:$0xff]  ;;  %v694_v50 = vld [vmem:[%s2767_s12 + $0x70] sm:$0xff] }
  0x26   : > { %770 = vperm.xlu1 %2438, %v699_v20   ;;  %722 = vperm.xlu0 %2437, %v683_v21   ;;  %v711_v51 = vld [vmem:[%s2767_s12 + $0xf8] sm:$0xff]  ;;  %v2908_v6 = vld [vmem:[%s3624_s5] ss:$0 sm:$0xff] }
  0x27   : > { %2335 = vmatmul.mubr.msk.bf16.gmra.mrb[4].mxu0 %vm3637_vm4, %v339_v14  ;;  %v695_v52 = vld [vmem:[%s2767_s12 + $0x78] sm:$0xff] }
  0x28   : > { %2338 = vmatprep.mubr.msk.bf16.mxu0 %vm3637_vm4, %v341_v15  ;;  %2267 = vmatpush3.bf16.msra.mxu1 %v339_v14 }
  0x29   : > { %2268 = vmatprep.subr.bf16.mxu1 %v357_v24 }
  0x2a   : > { %773 = vperm.xlu1 %2438, %v700_v25   ;;  %725 = vperm.xlu0 %2437, %v684_v26  }
  0x2c   : > { %2269 = vmatpush3.bf16.msra.mxu1 %v341_v15 }
  0x2d   : > { %2270 = vmatprep.subr.bf16.mxu1 %v359_v27 }
  0x2e   : > { %776 = vperm.xlu1 %2438, %v701_v28   ;;  %728 = vperm.xlu0 %2437, %v685_v29  }
  0x2f   : > { %2339 = vmatmul.mubr.msk.bf16.gmra.mrb[8].mxu0 %vm3637_vm4, %v343_v22 }
  0x30   : > { %2342 = vmatprep.mubr.msk.bf16.mxu0 %vm3637_vm4, %v345_v23  ;;  %2271 = vmatpush3.bf16.msra.mxu1 %v343_v22 }
  0x31   : > { %2272 = vmatprep.subr.bf16.mxu1 %v361_v31 }
  0x32   : > { %779 = vperm.xlu1 %2438, %v702_v32   ;;  %731 = vperm.xlu0 %2437, %v686_v33  }
  0x34   : > { %2273 = vmatpush3.bf16.msra.mxu1 %v345_v23 }
  0x35   : > { %2274 = vmatprep.subr.bf16.mxu1 %v363_v34 }
  0x36   : > { %782 = vperm.xlu1 %2438, %v703_v35   ;;  %734 = vperm.xlu0 %2437, %v687_v36  }
  0x37   : > { %2343 = vmatmul.mubr.msk.bf16.gmra.mrb[12].mxu0 %vm3637_vm4, %v347_v30 }
  0x38   : > { %2346 = vmatprep.mubr.msk.bf16.mxu0 %vm3637_vm4, %v2786_v8  ;;  %2275 = vmatpush3.bf16.msra.mxu1 %v347_v30 }
  0x3a   : > { %785 = vperm.xlu1 %2438, %v704_v37   ;;  %737 = vperm.xlu0 %2437, %v688_v38  }
  0x3e   : > { %788 = vperm.xlu1 %2438, %v705_v39   ;;  %740 = vperm.xlu0 %2437, %v689_v40  }
  0x3f   : > { %2347 = vmatmul.mubr.msk.bf16.gmra.mrb[16].mxu0 %vm3637_vm4, %v2791_v11 }
  0x40   : > { %2350 = vmatprep.mubr.msk.bf16.mxu0 %vm3637_vm4, %v353_v16 }
  0x42   : > { %791 = vperm.xlu1 %2438, %v706_v41   ;;  %743 = vperm.xlu0 %2437, %v690_v42  }
  0x46   : > { %794 = vperm.xlu1 %2438, %v707_v43   ;;  %746 = vperm.xlu0 %2437, %v691_v44  }
  0x47   : > { %2351 = vmatmul.mubr.msk.bf16.gmra.mrb[20].mxu0 %vm3637_vm4, %v2805_v19 }
  0x48   : > { %2354 = vmatprep.mubr.msk.bf16.mxu0 %vm3637_vm4, %v357_v24 }
  0x4a   : > { %797 = vperm.xlu1 %2438, %v708_v45   ;;  %749 = vperm.xlu0 %2437, %v692_v46  }
  0x4e   : > { %800 = vperm.xlu1 %2438, %v709_v47   ;;  %752 = vperm.xlu0 %2437, %v693_v48  }
  0x4f   : > { %2355 = vmatmul.mubr.msk.bf16.gmra.mrb[24].mxu0 %vm3637_vm4, %v359_v27 }
  0x50   : > { %2358 = vmatprep.mubr.msk.bf16.mxu0 %vm3637_vm4, %v361_v31 }
  0x52   : > { %803 = vperm.xlu1 %2438, %v710_v49   ;;  %755 = vperm.xlu0 %2437, %v694_v50  }
  0x56   : > { %806 = vperm.xlu1 %2438, %v711_v51   ;;  %758 = vperm.xlu0 %2437, %v695_v52  }
  0x57   : > { %2359 = vmatmul.mubr.msk.bf16.gmra.mrb[28].mxu0 %vm3637_vm4, %v363_v34 }
  0x99   : > { %v2857_v53 = vpop.permute.xlu1 %716  ;;  %v2940_v25 = vpop.permute.xlu0 %713 }
  0x9a   : > { %vm808_vm13 = vcmp.eq.s32.totalorder %v2871_v61, %v2940_v25  ;;  %vm809_vm14 = vcmp.eq.s32.totalorder %v2871_v61, %v2857_v53 }
  0x9d   : > { %v2859_v54 = vpop.permute.xlu1 %764  ;;  %v2950_v32 = vpop.permute.xlu0 %761 }
  0x9e   : > { %vm3644_vm4 = vcmp.eq.s32.totalorder %v2871_v61, %v2950_v32 }
  0xa1   : > { %v2861_v55 = vpop.permute.xlu1 %767  ;;  %v2960_v38 = vpop.permute.xlu0 %719 }
  0xa2   : > { %vm810_vm15 = vcmp.eq.s32.totalorder %v2871_v61, %v2960_v38 }
  0xa5   : > { %v2863_v56 = vpop.permute.xlu1 %770  ;;  %v2982_v45 = vpop.permute.xlu0 %722 }
  0xa6   : > { %vm811_vm0 = vcmp.eq.s32.totalorder %v2871_v61, %v2982_v45 }
  0xa9   : > { %v2865_v57 = vpop.permute.xlu1 %773  ;;  %v2994_v51 = vpop.permute.xlu0 %725 }
  0xaa   : > { %vm3638_vm1 = vcmp.eq.s32.totalorder %v2871_v61, %v2994_v51 }
  0xad   : > { %v2867_v58 = vpop.permute.xlu1 %776 }
  0xb1   : > { %v2869_v60 = vpop.permute.xlu1 %779 }
  0xb5   : > { %v2873_v62 = vpop.permute.xlu1 %782 }
  0xb6   : > { %vm831_vm5 = vcmp.eq.s32.totalorder %v2871_v61, %v2873_v62 }
  0xb9   : > { %v2877_v63 = vpop.permute.xlu1 %785 }
  0xba   : > { %vm3669_vm6 = vcmp.eq.s32.totalorder %v2871_v61, %v2877_v63 }
  0xbd   : > { %v2881_v0 = vpop.permute.xlu1 %788 }
  0xbe   : > { %vm3665_vm7 = vcmp.eq.s32.totalorder %v2871_v61, %v2881_v0 }
  0xc1   : > { %v2885_v1 = vpop.permute.xlu1 %791 }
  0xc2   : > { %vm3661_vm8 = vcmp.eq.s32.totalorder %v2871_v61, %v2885_v1 }
  0xc5   : > { %v2889_v2 = vpop.permute.xlu1 %794 }
  0xc6   : > { %vm3656_vm9 = vcmp.eq.s32.totalorder %v2871_v61, %v2889_v2 }
  0xc9   : > { %v2893_v3 = vpop.permute.xlu1 %797 }
  0xca   : > { %vm3657_vm10 = vcmp.eq.s32.totalorder %v2871_v61, %v2893_v3 }
  0xcd   : > { %v2897_v4 = vpop.permute.xlu1 %800 }
  0xce   : > { %vm3659_vm11 = vcmp.eq.s32.totalorder %v2871_v61, %v2897_v4 }
  0xd1   : > { %v2901_v5 = vpop.permute.xlu1 %803 }
  0xd2   : > { %vm3658_vm12 = vcmp.eq.s32.totalorder %v2871_v61, %v2901_v5 }
  0xf2   : > { %v2332_v7 = vpop.f32.mrb[0].mxu0 }
  0xf3   : > { %v2911_v8 = vadd.f32 %v2332_v7, %v2908_v6  ;;  %v551_v9 = vpop.f32.mrb[1].mxu0 }
  0xf4   : > { %v2333_v10 = vpop.f32.mrb[2].mxu0  ;;  %v2916_v12 = vadd.f32 %v2908_v6, %v551_v9 }
  0xf5   : > { %876 = vrot.lane.b32.xlu0 %v2911_v8, %s2697_s22  ;;  %v554_v11 = vpop.f32.mrb[3].mxu0  ;;  %v2921_v14 = vadd.f32 %v2333_v10, %v2908_v6 }
  0xf6   : > { %v2926_v18 = vadd.f32 %v2908_v6, %v554_v11 }
  0xf9   : > { %872 = vrot.lane.b32.xlu0 %v2916_v12, %s2697_s22 }
  0xfa   : > { %v2336_v13 = vpop.f32.mrb[4].mxu0 }
  0xfb   : > { %v567_v15 = vpop.f32.mrb[5].mxu0  ;;  %v2931_v20 = vadd.f32 %v2336_v13, %v2908_v6 }
  0xfc   : > { %v2337_v16 = vpop.f32.mrb[6].mxu0  ;;  %v2936_v24 = vadd.f32 %v2908_v6, %v567_v15 }
  0xfd   : > { %v570_v17 = vpop.f32.mrb[7].mxu0  ;;  %878 = vrot.lane.b32.xlu0 %v2921_v14, %s2697_s22  ;;  %v2943_v27 = vadd.f32 %v2337_v16, %v2908_v6 }
  0xfe   : > { %v2948_v31 = vadd.f32 %v2908_v6, %v570_v17 }
 0x101   : > { %874 = vrot.lane.b32.xlu0 %v2926_v18, %s2697_s22 }
 0x102   : > { %v2340_v19 = vpop.f32.mrb[8].mxu0 }
 0x103   : > { %v583_v21 = vpop.f32.mrb[9].mxu0  ;;  %v2955_v34 = vadd.f32 %v2340_v19, %v2908_v6 }
 0x104   : > { %v2341_v22 = vpop.f32.mrb[10].mxu0  ;;  %v2967_v40 = vadd.f32 %v2908_v6, %v583_v21  ;;  %v3025_v21 = vpop.permute.xlu0 %728 }
 0x105   : > { %v586_v23 = vpop.f32.mrb[11].mxu0  ;;  %884 = vrot.lane.b32.xlu0 %v2931_v20, %s2697_s22  ;;  %v2977_v43 = vadd.f32 %v2341_v22, %v2908_v6  ;;  %vm3642_vm2 = vcmp.eq.s32.totalorder %v2871_v61, %v3025_v21 }
 0x106   : > { %v2989_v49 = vadd.f32 %v2908_v6, %v586_v23 }
 0x107   : > { %3678 = vst [vmem:[#allocation11_spill] sm:$0xff] %v2977_v43 }
 0x108   : > { %3680 = vst [vmem:[#allocation13_spill] sm:$0xff] %v2989_v49 }
 0x109   : > { %880 = vrot.lane.b32.xlu0 %v2936_v24, %s2697_s22 }
 0x10a   : > { %v2344_v26 = vpop.f32.mrb[12].mxu0 }
 0x10b   : > { %v599_v28 = vpop.f32.mrb[13].mxu0  ;;  %v3004_v7 = vadd.f32 %v2344_v26, %v2908_v6 }
 0x10c   : > { %v2345_v29 = vpop.f32.mrb[14].mxu0  ;;  %v3023_v19 = vadd.f32 %v2908_v6, %v599_v28 }
 0x10d   : > { %v602_v30 = vpop.f32.mrb[15].mxu0  ;;  %886 = vrot.lane.b32.xlu0 %v2943_v27, %s2697_s22  ;;  %3683 = vst [vmem:[#allocation16_spill] sm:$0xff] %v3004_v7  ;;  %v3035_v26 = vadd.f32 %v2345_v29, %v2908_v6 }
 0x10e   : > { %3688 = vst [vmem:[#allocation21_spill] sm:$0xff] %v3023_v19 }
 0x10f   : > { %3690 = vst [vmem:[#allocation23_spill] sm:$0xff] %v3035_v26 }
 0x111   : > { %882 = vrot.lane.b32.xlu0 %v2948_v31, %s2697_s22 }
 0x112   : > { %v2348_v33 = vpop.f32.mrb[16].mxu0 }
 0x113   : > { %v2958_v35 = vadd.f32 %v2348_v33, %v2908_v6  ;;  %v615_v36 = vpop.f32.mrb[17].mxu0 }
 0x114   : > { %v2349_v37 = vpop.f32.mrb[18].mxu0  ;;  %v2970_v41 = vadd.f32 %v2908_v6, %v615_v36 }
 0x115   : > { %3676 = vst [vmem:[#allocation9_spill] sm:$0xff] %v2958_v35  ;;  %908 = vrot.lane.b32.xlu1 %v2958_v35, %s2697_s22  ;;  %v618_v39 = vpop.f32.mrb[19].mxu0  ;;  %892 = vrot.lane.b32.xlu0 %v2955_v34, %s2697_s22  ;;  %v2980_v44 = vadd.f32 %v2349_v37, %v2908_v6 }
 0x116   : > { %3677 = vst [vmem:[#allocation10_spill] sm:$0xff] %v2970_v41  ;;  %v2992_v50 = vadd.f32 %v2908_v6, %v618_v39 }
 0x117   : > { %3679 = vst [vmem:[#allocation12_spill] sm:$0xff] %v2980_v44 }
 0x118   : > { %3681 = vst [vmem:[#allocation14_spill] sm:$0xff] %v2992_v50 }
 0x119   : > { %904 = vrot.lane.b32.xlu1 %v2970_v41, %s2697_s22  ;;  %888 = vrot.lane.b32.xlu0 %v2967_v40, %s2697_s22  ;;  %v1069_v41 = vld [vmem:[#allocation2 + $0x8] sm:$0xf] }
 0x11a   : > { %v2352_v42 = vpop.f32.mrb[20].mxu0 }
 0x11b   : > { %v631_v46 = vpop.f32.mrb[21].mxu0  ;;  %v2997_v52 = vadd.f32 %v2352_v42, %v2908_v6  ;;  %v3046_v42 = vpop.permute.xlu0 %731 }
 0x11c   : > { %v2353_v47 = vpop.f32.mrb[22].mxu0  ;;  %v3028_v22 = vadd.f32 %v2908_v6, %v631_v46  ;;  %vm3640_vm3 = vcmp.eq.s32.totalorder %v2871_v61, %v3046_v42 }
 0x11d   : > { %910 = vrot.lane.b32.xlu1 %v2980_v44, %s2697_s22  ;;  %894 = vrot.lane.b32.xlu0 %v2977_v43, %s2697_s22  ;;  %v634_v48 = vpop.f32.mrb[23].mxu0  ;;  %3682 = vst [vmem:[#allocation15_spill] sm:$0xff] %v2997_v52  ;;  %v3038_v33 = vadd.f32 %v2353_v47, %v2908_v6 }
 0x11e   : > { %3689 = vst [vmem:[#allocation22_spill] sm:$0xff] %v3028_v22 }
 0x11f   : > { %3691 = vst [vmem:[#allocation24_spill] sm:$0xff] %v3038_v33 }
 0x121   : > { %906 = vrot.lane.b32.xlu1 %v2992_v50, %s2697_s22  ;;  %890 = vrot.lane.b32.xlu0 %v2989_v49, %s2697_s22 }
 0x122   : > { %v2356_v59 = vpop.f32.mrb[24].mxu0 }
 0x123   : > { %v3007_v9 = vadd.f32 %v2356_v59, %v2908_v6  ;;  %v647_v10 = vpop.f32.mrb[25].mxu0  ;;  %v3059_v59 = vadd.f32 %v2908_v6, %v602_v30 }
 0x124   : > { %v3010_v11 = vadd.f32 %v2908_v6, %v647_v10  ;;  %v2357_v13 = vpop.f32.mrb[26].mxu0  ;;  %v3062_v10 = vadd.f32 %v2908_v6, %v634_v48 }
 0x125   : > { %3684 = vst [vmem:[#allocation17_spill] sm:$0xff] %v3007_v9  ;;  %916 = vrot.lane.b32.xlu1 %v2997_v52, %s2697_s22  ;;  %900 = vrot.lane.b32.xlu0 %v3004_v7, %s2697_s22  ;;  %v3017_v15 = vadd.f32 %v2357_v13, %v2908_v6  ;;  %v650_v16 = vpop.f32.mrb[27].mxu0  ;;  %3696 = vst [vmem:[#allocation29_spill] sm:$0xff] %v3059_v59  ;;  %v3068_v13 = vpop.permute.xlu0 %734 }
 0x126   : > { %3685 = vst [vmem:[#allocation18_spill] sm:$0xff] %v3010_v11  ;;  %v3020_v17 = vadd.f32 %v2908_v6, %v650_v16  ;;  %3697 = vst [vmem:[#allocation30_spill] sm:$0xff] %v3062_v10 }
 0x127   : > { %3686 = vst [vmem:[#allocation19_spill] sm:$0xff] %v3017_v15 }
 0x128   : > { %3687 = vst [vmem:[#allocation20_spill] sm:$0xff] %v3020_v17 }
 0x129   : > { %912 = vrot.lane.b32.xlu1 %v3028_v22, %s2697_s22  ;;  %896 = vrot.lane.b32.xlu0 %v3023_v19, %s2697_s22  ;;  %v3072_v16 = vpop.permute.xlu0 %737 }
 0x12a   : > { %v2360_v23 = vpop.f32.mrb[28].mxu0 }
 0x12b   : > { %v3041_v28 = vadd.f32 %v2360_v23, %v2908_v6  ;;  %v663_v36 = vpop.f32.mrb[29].mxu0 }
 0x12c   : > { %v3044_v37 = vadd.f32 %v2908_v6, %v663_v36  ;;  %v2361_v39 = vpop.f32.mrb[30].mxu0 }
 0x12d   : > { %3692 = vst [vmem:[#allocation25_spill] sm:$0xff] %v3041_v28  ;;  %918 = vrot.lane.b32.xlu1 %v3038_v33, %s2697_s22  ;;  %902 = vrot.lane.b32.xlu0 %v3035_v26, %s2697_s22  ;;  %v3053_v29 = vadd.f32 %v2361_v39, %v2908_v6  ;;  %v666_v46 = vpop.f32.mrb[31].mxu0 }
 0x12e   : > { %3693 = vst [vmem:[#allocation26_spill] sm:$0xff] %v3044_v37  ;;  %v3056_v47 = vadd.f32 %v2908_v6, %v666_v46  ;;  %v3078_v6 = vpop.permute.xlu0 %740 }
 0x12f   : > { %3694 = vst [vmem:[#allocation27_spill] sm:$0xff] %v3053_v29 }
 0x130   : > { %3695 = vst [vmem:[#allocation28_spill] sm:$0xff] %v3056_v47 }
 0x131   : > { %914 = vrot.lane.b32.xlu1 %v3062_v10, %s2697_s22  ;;  %898 = vrot.lane.b32.xlu0 %v3059_v59, %s2697_s22 }
 0x132   : > { %v3082_v30 = vpop.permute.xlu0 %743 }
 0x135   : > { %924 = vrot.lane.b32.xlu1 %v3007_v9, %s2697_s22 }
 0x136   : > { %v3088_v48 = vpop.permute.xlu0 %746 }
 0x139   : > { %920 = vrot.lane.b32.xlu1 %v3010_v11, %s2697_s22 }
 0x13a   : > { %v3092_v23 = vpop.permute.xlu0 %749 }
 0x13d   : > { %926 = vrot.lane.b32.xlu1 %v3017_v15, %s2697_s22 }
 0x13e   : > { %v3096_v36 = vpop.permute.xlu0 %752 }
 0x141   : > { %922 = vrot.lane.b32.xlu1 %v3020_v17, %s2697_s22 }
 0x142   : > { %v3098_v39 = vpop.permute.xlu0 %755 }
 0x145   : > { %932 = vrot.lane.b32.xlu1 %v3041_v28, %s2697_s22 }
 0x146   : > { %v3100_v46 = vpop.permute.xlu0 %758 }
 0x149   : > { %928 = vrot.lane.b32.xlu1 %v3044_v37, %s2697_s22 }
 0x14d   : > { %934 = vrot.lane.b32.xlu1 %v3053_v29, %s2697_s22 }
 0x151   : > { %930 = vrot.lane.b32.xlu1 %v3056_v47, %s2697_s22 }
 0x167   : > { %v877_v28 = vpop.permute.xlu0 %876 }
 0x168   : > { %v970_v9 = vsel %vm810_vm15, %v877_v28, -1e+30 }
 0x16b   : > { %v873_v37 = vpop.permute.xlu0 %872 }
 0x16c   : > { %v968_v29 = vsel %vm808_vm13, %v873_v37, -1e+30 }
 0x16d   : > { %1000 = vxpose.xlu0.b32.start [1/16] (narrow) %v968_v29, 16 }
 0x16f   : > { %v879_v17 = vpop.permute.xlu0 %878 }
 0x170   : > { %v971_v29 = vsel %vm811_vm0, %v879_v17, -1e+30 }
 0x173   : > { %v875_v47 = vpop.permute.xlu0 %874 }
 0x174   : > { %v969_v15 = vsel %vm809_vm14, %v875_v47, -1e+30 }
 0x175   : > { %1001 = vxpose.xlu0.b32.cont [2/16] (narrow) %v969_v15, 16 }
 0x177   : > { %v885_v11 = vpop.permute.xlu0 %884 }
 0x179   : > { %1002 = vxpose.xlu0.b32.cont [3/16] (narrow) %v970_v9, 16  ;;  %v3129_v9 = vpop.permute.xlu1 %806 }
 0x17b   : > { %v881_v37 = vpop.permute.xlu0 %880 }
 0x17c   : > { %v972_v47 = vsel %vm3638_vm1, %v881_v37, -1e+30  ;;  %v974_v37 = vsel %vm3640_vm3, %v885_v11, -1e+30  ;;  %vm3643_vm1 = vcmp.eq.s32.totalorder %v2871_v61, %v3068_v13  ;;  %vm3645_vm3 = vcmp.eq.s32.totalorder %v2871_v61, %v3072_v16 }
 0x17d   : > { %1003 = vxpose.xlu0.b32.cont [4/16] (narrow) %v971_v29, 16 }
 0x17f   : > { %v887_v15 = vpop.permute.xlu0 %886 }
 0x181   : > { %1004 = vxpose.xlu0.b32.cont [5/16] (narrow) %v972_v47, 16 }
 0x183   : > { %v883_v28 = vpop.permute.xlu0 %882 }
 0x184   : > { %v973_v17 = vsel %vm3642_vm2, %v883_v28, -1e+30  ;;  %v975_v28 = vsel %vm3643_vm1, %v887_v15, -1e+30  ;;  %vm3647_vm2 = vcmp.eq.s32.totalorder %v2871_v61, %v2859_v54  ;;  %vm3648_vm1 = vcmp.eq.s32.totalorder %v2871_v61, %v3078_v6 }
 0x185   : > { %1005 = vxpose.xlu0.b32.cont [6/16] (narrow) %v973_v17, 16 }
 0x187   : > { %v909_v29 = vpop.permute.xlu1 %908  ;;  %v893_v10 = vpop.permute.xlu0 %892 }
 0x189   : > { %1006 = vxpose.xlu0.b32.cont [7/16] (narrow) %v974_v37, 16 }
 0x18b   : > { %v905_v47 = vpop.permute.xlu1 %904  ;;  %v889_v33 = vpop.permute.xlu0 %888 }
 0x18c   : > { %v984_v17 = vsel %vm3644_vm4, %v905_v47, -1e+30  ;;  %v976_v22 = vsel %vm3645_vm3, %v889_v33, -1e+30  ;;  %vm3649_vm4 = vcmp.eq.s32.totalorder %v2871_v61, %v2861_v55  ;;  %vm3650_vm3 = vcmp.eq.s32.totalorder %v2871_v61, %v3082_v30 }
 0x18d   : > { %1032 = vxpose.xlu1.b32.start [1/16] (narrow) %v984_v17, 16  ;;  %1007 = vxpose.xlu0.b32.cont [8/16] (narrow) %v975_v28, 16  ;;  %v986_v52 = vsel %vm3649_vm4, %v909_v29, -1e+30  ;;  %vm3653_vm4 = vcmp.eq.s32.totalorder %v2871_v61, %v2865_v57 }
 0x18f   : > { %v911_v11 = vpop.permute.xlu1 %910  ;;  %v895_v37 = vpop.permute.xlu0 %894 }
 0x191   : > { %1008 = vxpose.xlu0.b32.cont [9/16] (narrow) %v976_v22, 16 }
 0x193   : > { %v907_v15 = vpop.permute.xlu1 %906  ;;  %v891_v47 = vpop.permute.xlu0 %890 }
 0x194   : > { %v985_v28 = vsel %vm3647_vm2, %v907_v15, -1e+30  ;;  %v977_v17 = vsel %vm3648_vm1, %v891_v47, -1e+30  ;;  %v978_v15 = vsel %vm3650_vm3, %v893_v10, -1e+30  ;;  %vm3651_vm2 = vcmp.eq.s32.totalorder %v2871_v61, %v2863_v56 }
 0x195   : > { %1033 = vxpose.xlu1.b32.cont [2/16] (narrow) %v985_v28, 16  ;;  %1009 = vxpose.xlu0.b32.cont [10/16] (narrow) %v977_v17, 16  ;;  %vm3652_vm1 = vcmp.eq.s32.totalorder %v2871_v61, %v3088_v48  ;;  %v987_v17 = vsel %vm3651_vm2, %v911_v11, -1e+30  ;;  %vm3654_vm3 = vcmp.eq.s32.totalorder %v2871_v61, %v3092_v23  ;;  %vm3655_vm2 = vcmp.eq.s32.totalorder %v2871_v61, %v2867_v58 }
 0x196   : > { %v979_v29 = vsel %vm3652_vm1, %v895_v37, -1e+30  ;;  %vm821_vm1 = vcmp.eq.s32.totalorder %v2871_v61, %v3096_v36 }
 0x197   : > { %v917_v22 = vpop.permute.xlu1 %916  ;;  %v901_v33 = vpop.permute.xlu0 %900 }
 0x199   : > { %1034 = vxpose.xlu1.b32.cont [3/16] (narrow) %v986_v52, 16  ;;  %1010 = vxpose.xlu0.b32.cont [11/16] (narrow) %v978_v15, 16 }
 0x19b   : > { %v913_v47 = vpop.permute.xlu1 %912  ;;  %v897_v28 = vpop.permute.xlu0 %896 }
 0x19c   : > { %v988_v15 = vsel %vm3653_vm4, %v913_v47, -1e+30  ;;  %v980_v11 = vsel %vm3654_vm3, %v897_v28, -1e+30  ;;  %vm830_vm4 = vcmp.eq.s32.totalorder %v2871_v61, %v2869_v60  ;;  %vm822_vm3 = vcmp.eq.s32.totalorder %v2871_v61, %v3098_v39 }
 0x19d   : > { %1035 = vxpose.xlu1.b32.cont [4/16] (narrow) %v987_v17, 16  ;;  %1011 = vxpose.xlu0.b32.cont [12/16] (narrow) %v979_v29, 16 }
 0x19f   : > { %v919_v52 = vpop.permute.xlu1 %918  ;;  %v903_v10 = vpop.permute.xlu0 %902 }
 0x1a1   : > { %1036 = vxpose.xlu1.b32.cont [5/16] (narrow) %v988_v15, 16  ;;  %1012 = vxpose.xlu0.b32.cont [13/16] (narrow) %v980_v11, 16  ;;  %v990_v15 = vsel %vm830_vm4, %v917_v22, -1e+30  ;;  %v982_v11 = vsel %vm822_vm3, %v901_v33, -1e+30 }
 0x1a3   : > { %v915_v37 = vpop.permute.xlu1 %914  ;;  %v899_v17 = vpop.permute.xlu0 %898 }
 0x1a4   : > { %v989_v29 = vsel %vm3655_vm2, %v915_v37, -1e+30  ;;  %v981_v47 = vsel %vm821_vm1, %v899_v17, -1e+30  ;;  %vm823_vm2 = vcmp.eq.s32.totalorder %v2871_v61, %v3100_v46  ;;  %v991_v17 = vsel %vm831_vm5, %v919_v52, -1e+30 }
 0x1a5   : > { %1037 = vxpose.xlu1.b32.cont [6/16] (narrow) %v989_v29, 16  ;;  %1013 = vxpose.xlu0.b32.cont [14/16] (narrow) %v981_v47, 16  ;;  %v983_v29 = vsel %vm823_vm2, %v903_v10, -1e+30 }
 0x1a7   : > { %v925_v28 = vpop.permute.xlu1 %924 }
 0x1a8   : > { %v994_v52 = vsel %vm3661_vm8, %v925_v28, -1e+30  ;;  %vm1127_vm8 = vcmask 7168  }
 0x1a9   : > { %1038 = vxpose.xlu1.b32.cont [7/16] (narrow) %v990_v15, 16  ;;  %1014 = vxpose.xlu0.b32.cont [15/16] (narrow) %v982_v11, 16 }
 0x1ab   : > { %v921_v37 = vpop.permute.xlu1 %920 }
 0x1ac   : > { %v992_v33 = vsel %vm3669_vm6, %v921_v37, -1e+30  ;;  %vm1347_vm6 = vcmask 1045504  }
 0x1ad   : > { %1039 = vxpose.xlu1.b32.cont [8/16] (narrow) %v991_v17, 16  ;;  %1015 = vxpose.xlu0.b32.end [16/16] (narrow) %v983_v29, 16 }
 0x1af   : > { %v927_v22 = vpop.permute.xlu1 %926 }
 0x1b0   : > { %v995_v17 = vsel %vm3656_vm9, %v927_v22, -1e+30  ;;  %vm3660_vm9 = vcmp.eq.s32.totalorder %v2871_v61, %v3129_v9 }
 0x1b1   : > { %1040 = vxpose.xlu1.b32.cont [9/16] (narrow) %v992_v33, 16 }
 0x1b3   : > { %v923_v47 = vpop.permute.xlu1 %922 }
 0x1b4   : > { %v993_v15 = vsel %vm3665_vm7, %v923_v47, -1e+30  ;;  %vm3674_vm7 = vcmask 3072  }
 0x1b5   : > { %1041 = vxpose.xlu1.b32.cont [10/16] (narrow) %v993_v15, 16 }
 0x1b7   : > { %v933_v11 = vpop.permute.xlu1 %932 }
 0x1b8   : > { %v998_v28 = vsel %vm3658_vm12, %v933_v11, -1e+30 }
 0x1b9   : > { %1042 = vxpose.xlu1.b32.cont [11/16] (narrow) %v994_v52, 16 }
 0x1bb   : > { %v929_v10 = vpop.permute.xlu1 %928 }
 0x1bc   : > { %v996_v29 = vsel %vm3657_vm10, %v929_v10, -1e+30  ;;  %vm1073_vm10 = vcmask 1043456  }
 0x1bd   : > { %1043 = vxpose.xlu1.b32.cont [12/16] (narrow) %v995_v17, 16 }
 0x1bf   : > { %v935_v37 = vpop.permute.xlu1 %934 }
 0x1c0   : > { %v999_v22 = vsel %vm3660_vm9, %v935_v37, -1e+30 }
 0x1c1   : > { %1044 = vxpose.xlu1.b32.cont [13/16] (narrow) %v996_v29, 16 }
 0x1c3   : > { %v931_v33 = vpop.permute.xlu1 %930 }
 0x1c4   : > { %v997_v47 = vsel %vm3659_vm11, %v931_v33, -1e+30 }
 0x1c5   : > { %1045 = vxpose.xlu1.b32.cont [14/16] (narrow) %v997_v47, 16 }
 0x1c9   : > { %1046 = vxpose.xlu1.b32.cont [15/16] (narrow) %v998_v28, 16  ;;  %v3670_v28 = vmov 1.0|1.0  }
 0x1cd   : > { %1047 = vxpose.xlu1.b32.end [16/16] (narrow) %v999_v22, 16  ;;  %v1068_v22 = vld [vmem:[#allocation2] sm:$0xff] }
 0x1f1   : > { %v3248_v15 = vpop.trf.xlu0 }
 0x1f5   : > { %v3251_v17 = vpop.trf.xlu0 }
 0x1f6   : > { %v1074_v11 = vsel %vm1073_vm10, %v3251_v17, -inf }
 0x211   : > { %v1048_v52 = vpop.trf.xlu1 }
 0x212   : > { %v1070_v10 = vmax.f32 %v3248_v15, %v1048_v52  ;;  %vm1065_vm12 = vcmp.gt.f32.partialorder %v1048_v52, -1e+29 }
 0x214   : > { %1071 = vmax.xlane.f32.xlu0 %v1070_v10 }
 0x215   : > { %v1049_v29 = vpop.trf.xlu1 }
 0x216   : > { %vm1067_vm11 = vcmp.gt.f32.partialorder %v1049_v29, -1e+29  ;;  %v1075_v33 = vsel %vm1073_vm10, %v1049_v29, -inf }
 0x217   : > { %vm3258_vm9 = vmpackc.low %vm1067_vm11, %vm1065_vm12  ;;  %v1076_v47 = vmax.f32 %v1074_v11, %v1075_v33  ;;  %v2457_v11 = vld [vmem:[%s3621_s2] sm:$0x3f]  }
 0x218   : > { %2226 = vmatprep.mubr.msk.bf16.mxu0 %vm3258_vm9, %v3670_v28  ;;  %2408 = vmatprep.subr.msk.bf16.mxu1 %vm1347_vm6, %v2457_v11  ;;  %v1349_v33 = vsel %vm1347_vm6, %v2457_v11, 0  ;;  %vm1066_vm6 = vcmp.gt.f32.partialorder %v3251_v17, -1e+29 }
 0x219   : > { %1077 = vmax.xlane.f32.xlu1 %v1076_v47 }
 0x2a1   : > { %v1072_v10 = vpop.xlane.xlu0 %1071 }
 0x2a2   : > { %v1079_v50 = vmax.f32 %v1068_v22, %v1072_v10 }
 0x2a4   : > { %v1081_v44 = vsub.f32 %v1068_v22, %v1079_v50  ;;  %1209 = vst.msk [vmem:[#allocation2] sm:$0xff] %vm1127_vm8, %v1079_v50  ;;  %1089 = vperm.xlu0 %2437, %v1079_v50  }
 0x2a6   : > { %v1078_v35 = vpop.xlane.xlu1 %1077 }
 0x2a7   : > { %v1080_v59 = vmax.f32 %v1069_v41, %v1078_v35 }
 0x2a9   : > { %v1082_v26 = vsub.f32 %v1069_v41, %v1080_v59  ;;  %1210 = vst.msk [vmem:[#allocation2 + $0x8] sm:$0xf] %vm3674_vm7, %v1080_v59  ;;  %1094 = vperm.xlu1 %2438, %v1080_v59   ;;  %vm1064_vm7 = vcmp.gt.f32.partialorder %v3248_v15, -1e+29 }
 0x323   : > { %v1090_v47 = vpop.permute.xlu0 %1089 }
 0x324   : > { %v1097_v22 = vsub.f32 %v3248_v15, %v1090_v47  ;;  %v1098_v10 = vsub.f32 %v1048_v52, %v1090_v47 }
 0x326   : > { %v1101_v50 = vmul.f32 1.442695, %v1097_v22  ;;  %v1103_v28 = vmul.f32 1.442695, %v1098_v10 }
 0x328   : > { %2474 = vpow2.f32 %v1101_v50  ;;  %v1095_v19 = vpop.permute.xlu1 %1094 }
 0x329   : > { %2476 = vpow2.f32 %v1103_v28  ;;  %v1099_v35 = vsub.f32 %v3251_v17, %v1095_v19  ;;  %v1100_v41 = vsub.f32 %v1049_v29, %v1095_v19  ;;  %v2699_v19 = vmov 0.0  }
 0x32a   : > { %v2140_v50 = vsel %vm808_vm13, 1.0, %v2699_v19  ;;  %vm3296_vm13 = vmpackc.low %vm1066_vm6, %vm1064_vm7  ;;  %v2142_v15 = vsel %vm810_vm15, 1.0, %v2699_v19  ;;  %v2143_v17 = vsel %vm811_vm0, 1.0, %v2699_v19  ;;  %v1085_v29 = vmul.f32 1.442695, %v1082_v26 }
 0x32b   : > { %v1105_v59 = vmul.f32 1.442695, %v1099_v35  ;;  %v1107_v7 = vmul.f32 1.442695, %v1100_v41  ;;  %vm3707_vm15 = vcmp.eq.s32.totalorder %v2871_v61, %v3078_v6  ;;  %vm3708_vm0 = vcmp.eq.s32.totalorder %v2871_v61, %v3082_v30 }
 0x32c   : > { %v2149_v26 = vsel %vm3707_vm15, 1.0, %v2699_v19  ;;  %v2154_v30 = vsel %vm822_vm3, 1.0, %v2699_v19  ;;  %vm3714_vm3 = vcmp.eq.s32.totalorder %v2871_v61, %v2863_v56  ;;  %v2163_v56 = vsel %vm831_vm5, 1.0, %v2699_v19 }
 0x32d   : > { %2478 = vpow2.f32 %v1105_v59  ;;  %vm3718_vm15 = vcmp.eq.s32.totalorder %v2871_v61, %v2881_v0  ;;  %vm3720_vm5 = vcmp.eq.s32.totalorder %v2871_v61, %v2889_v2 }
 0x32e   : > { %2480 = vpow2.f32 %v1107_v7  ;;  %v2141_v7 = vsel %vm809_vm14, 1.0, %v2699_v19  ;;  %vm3706_vm14 = vcmp.eq.s32.totalorder %v2871_v61, %v3072_v16  ;;  %v2167_v62 = vsel %vm3720_vm5, 1.0, %v2699_v19 }
 0x332   : > { %v2475_v49 = vpop.eup %2474 }
 0x333   : > { %v2477_v11 = vpop.eup %2476  ;;  %v1109_v43 = vsel %vm1064_vm7, %v2475_v49, 0.0  ;;  %vm3702_vm7 = vcmp.eq.s32.totalorder %v2871_v61, %v2994_v51 }
 0x334   : > { %v1110_v47 = vsel %vm1065_vm12, %v2477_v11, 0.0  ;;  %vm1298_vm12 = vcmask 97280   ;;  %v2144_v37 = vsel %vm3702_vm7, 1.0, %v2699_v19  ;;  %vm3710_vm7 = vcmp.eq.s32.totalorder %v2871_v61, %v3092_v23 }
 0x335   : > { %v1117_v22 = vadd.f32 %v1110_v47, %v1109_v43  ;;  %v2152_v6 = vsel %vm3710_vm7, 1.0, %v2699_v19  ;;  %vm3723_vm7 = vcmp.eq.s32.totalorder %v2871_v61, %v2901_v5  ;;  %v1131_v5 = vld [vmem:[#allocation4] sm:$0xff] }
 0x337   : > { %v2479_v10 = vpop.eup %2478  ;;  %1118 = vadd.xlane.f32.xlu0 %v1117_v22  ;;  %v1275_v22 = vpack.c.bf16 %v2141_v7, %v2140_v50  ;;  %v2153_v7 = vsel %vm821_vm1, 1.0, %v2699_v19  ;;  %vm3711_vm1 = vcmp.eq.s32.totalorder %v2871_v61, %v2859_v54  ;;  %v2159_v54 = vsel %vm3714_vm3, 1.0, %v2699_v19 }
 0x338   : > { %v2481_v28 = vpop.eup %2480  ;;  %v2138_v35 = vpack.c.bf16 %v2479_v10, %v2475_v49  ;;  %v1111_v43 = vsel %vm1066_vm6, %v2479_v10, 0.0  ;;  %v1083_v49 = vmul.f32 1.442695, %v1081_v44  ;;  %vm3709_vm6 = vcmp.eq.s32.totalorder %v2871_v61, %v3088_v48 }
 0x339   : > { %v2135_v52 = vpack.c.bf16 %v2481_v28, %v2477_v11  ;;  %v1112_v41 = vsel %vm1067_vm11, %v2481_v28, 0.0  ;;  %v1120_v59 = vsel %vm1073_vm10, %v1111_v43, 0.0  ;;  %vm3705_vm11 = vcmp.eq.s32.totalorder %v2871_v61, %v3068_v13 }
 0x33a   : > { %v1121_v47 = vsel %vm1073_vm10, %v1112_v41, 0.0  ;;  %2482 = vpow2.f32 %v1083_v49  ;;  %vm3704_vm10 = vcmp.eq.s32.totalorder %v2871_v61, %v3046_v42  ;;  %v2147_v51 = vsel %vm3705_vm11, 1.0, %v2699_v19 }
 0x33b   : > { %2136 = vmatprep.mubr.msk.bf16.mxu1 %vm3258_vm9, %v2135_v52  ;;  %v1122_v25 = vadd.f32 %v1121_v47, %v1120_v59  ;;  %vm3703_vm9 = vcmp.eq.s32.totalorder %v2871_v61, %v3025_v21  ;;  %2484 = vpow2.f32 %v1085_v29  ;;  %v2146_v45 = vsel %vm3704_vm10, 1.0, %v2699_v19 }
 0x33c   : > { %2139 = vmatmul.mubr.msk.bf16.vlgmr.msra.gmra.mrb[0].mxu1 %vm3296_vm13, %v2138_v35  ;;  %v2145_v44 = vsel %vm3703_vm9, 1.0, %v2699_v19  ;;  %v2148_v21 = vsel %vm3706_vm14, 1.0, %v2699_v19  ;;  %v1278_v11 = vpack.c.bf16 %v2147_v51, %v2146_v45  ;;  %v2150_v13 = vsel %vm3708_vm0, 1.0, %v2699_v19 }
 0x33d   : > { %1123 = vadd.xlane.f32.xlu1 %v1122_v25  ;;  %2364 = vmatprep.mubr.msk.bf16.mxu1 %vm1298_vm12, %v1275_v22  ;;  %v1277_v38 = vpack.c.bf16 %v2145_v44, %v2144_v37  ;;  %v1279_v10 = vpack.c.bf16 %v2149_v26, %v2148_v21  ;;  %v2151_v16 = vsel %vm3709_vm6, 1.0, %v2699_v19  ;;  %v1281_v35 = vpack.c.bf16 %v2153_v7, %v2152_v6  ;;  %v1114_v37 = vld [vmem:[#allocation3 + $0x8] sm:$0xf] }
 0x33e   : > { %2363 = vmatpush3.bf16.msra.mxu1 %v1349_v33  ;;  %v1276_v33 = vpack.c.bf16 %v2143_v17, %v2142_v15  ;;  %v1280_v50 = vpack.c.bf16 %v2151_v16, %v2150_v13  ;;  %v2155_v48 = vsel %vm823_vm2, 1.0, %v2699_v19  ;;  %v2157_v23 = vsel %vm3711_vm1, 1.0, %v2699_v19 }
 0x33f   : > { %vm3712_vm9 = vcmp.eq.s32.totalorder %v2871_v61, %v2950_v32  ;;  %v1282_v43 = vpack.c.bf16 %v2155_v48, %v2154_v30  ;;  %vm3713_vm2 = vcmp.eq.s32.totalorder %v2871_v61, %v2861_v55  ;;  %vm3715_vm10 = vcmp.eq.s32.totalorder %v2871_v61, %v2865_v57 }
 0x340   : > { %v2156_v36 = vsel %vm3712_vm9, 1.0, %v2699_v19  ;;  %v2158_v39 = vsel %vm3713_vm2, 1.0, %v2699_v19  ;;  %v2160_v32 = vsel %vm3715_vm10, 1.0, %v2699_v19  ;;  %vm3716_vm11 = vcmp.eq.s32.totalorder %v2871_v61, %v2867_v58 }
 0x341   : > { %v1283_v52 = vpack.c.bf16 %v2157_v23, %v2156_v36  ;;  %v2161_v46 = vsel %vm3716_vm11, 1.0, %v2699_v19  ;;  %v1284_v41 = vpack.c.bf16 %v2159_v54, %v2158_v39  ;;  %v2162_v55 = vsel %vm830_vm4, 1.0, %v2699_v19 }
 0x342   : > { %v1285_v59 = vpack.c.bf16 %v2161_v46, %v2160_v32  ;;  %vm3717_vm14 = vcmp.eq.s32.totalorder %v2871_v61, %v2877_v63  ;;  %v2165_v58 = vsel %vm3718_vm15, 1.0, %v2699_v19  ;;  %v1286_v47 = vpack.c.bf16 %v2163_v56, %v2162_v55 }
 0x343   : > { %v2164_v57 = vsel %vm3717_vm14, 1.0, %v2699_v19  ;;  %vm3719_vm4 = vcmp.eq.s32.totalorder %v2871_v61, %v2885_v1  ;;  %vm3721_vm0 = vcmp.eq.s32.totalorder %v2871_v61, %v2893_v3  ;;  %vm3722_vm6 = vcmp.eq.s32.totalorder %v2871_v61, %v2897_v4  ;;  %v1113_v4 = vld [vmem:[#allocation3] sm:$0xff] }
 0x344   : > { %2365 = vmatmul.mubr.msk.bf16.vlgmr.msra.gmra.mrb[4].mxu1 %vm1298_vm12, %v1276_v33  ;;  %v2483_v28 = vpop.eup %2482  ;;  %v1287_v22 = vpack.c.bf16 %v2165_v58, %v2164_v57  ;;  %v2166_v60 = vsel %vm3719_vm4, 1.0, %v2699_v19  ;;  %v2168_v63 = vsel %vm3721_vm0, 1.0, %v2699_v19  ;;  %v2169_v0 = vsel %vm3722_vm6, 1.0, %v2699_v19 }
 0x345   : > { %2368 = vmatprep.mubr.msk.bf16.mxu1 %vm1298_vm12, %v1277_v38  ;;  %v2485_v42 = vpop.eup %2484  ;;  %v1288_v25 = vpack.c.bf16 %v2167_v62, %v2166_v60  ;;  %v1289_v49 = vpack.c.bf16 %v2169_v0, %v2168_v63  ;;  %v2170_v1 = vsel %vm3723_vm7, 1.0, %v2699_v19  ;;  %vm3724_vm1 = vcmp.eq.s32.totalorder %v2871_v61, %v3129_v9  ;;  %v1132_v61 = vld [vmem:[#allocation4 + $0x8] sm:$0xf] }
 0x346   : > { %v2171_v2 = vsel %vm3724_vm1, 1.0, %v2699_v19  ;;  %v1115_v15 = vmul.f32 %v2483_v28, %v1113_v4  ;;  %v1116_v44 = vmul.f32 %v2485_v42, %v1114_v37  ;;  %vm3725_vm9 = vcmask 3072  }
 0x347   : > { %v1290_v3 = vpack.c.bf16 %v2171_v2, %v2170_v1  ;;  %vm3751_vm3 = vcmask (!%p2229_p5), 261120   ;;  %vm1949_vm11 = vcmask (!%p2229_p5), 523264  }
 0x348   : > { %vm3752_vm10 = vmmov (!%p2229_p5), %vm3751_vm3 }
 0x349   : > { %vm3753_vm14 = vmmov (!%p2229_p5), %vm3751_vm3 }
 0x34c   : > { %2369 = vmatmul.mubr.msk.bf16.gmra.mrb[8].mxu1 %vm1298_vm12, %v1278_v11 }
 0x34d   : > { %2372 = vmatprep.mubr.msk.bf16.mxu1 %vm1298_vm12, %v1279_v10  ;;  %1135 = vperm.xlu0 %2437, %v2483_v28  }
 0x34e   : > { %1140 = vperm.xlu1 %2438, %v2485_v42  }
 0x354   : > { %2373 = vmatmul.mubr.msk.bf16.gmra.mrb[12].mxu1 %vm1298_vm12, %v1280_v50 }
 0x355   : > { %2376 = vmatprep.mubr.msk.bf16.mxu1 %vm1298_vm12, %v1281_v35 }
 0x35c   : > { %2377 = vmatmul.mubr.msk.bf16.gmra.mrb[16].mxu1 %vm1298_vm12, %v1282_v43 }
 0x35d   : > { %2380 = vmatprep.mubr.msk.bf16.mxu1 %vm1298_vm12, %v1283_v52 }
 0x364   : > { %2381 = vmatmul.mubr.msk.bf16.gmra.mrb[20].mxu1 %vm1298_vm12, %v1284_v41 }
 0x365   : > { %2384 = vmatprep.mubr.msk.bf16.mxu1 %vm1298_vm12, %v1285_v59 }
 0x36c   : > { %2385 = vmatmul.mubr.msk.bf16.gmra.mrb[24].mxu1 %vm1298_vm12, %v1286_v47 }
 0x36d   : > { %2388 = vmatprep.mubr.msk.bf16.mxu1 %vm1298_vm12, %v1287_v22 }
 0x374   : > { %2389 = vmatmul.mubr.msk.bf16.gmra.mrb[28].mxu1 %vm1298_vm12, %v1288_v25 }
 0x375   : > { %2392 = vmatprep.mubr.msk.bf16.mxu1 %vm1298_vm12, %v1289_v49 }
 0x37c   : > { %2393 = vmatmul.mubr.msk.bf16.gmra.mrb[32].mxu1 %vm1298_vm12, %v1290_v3  ;;  %vm1207_vm12 = vcmask 257024   ;;  %v3727_v3 = vld [vmem:[#allocation11_spill] sm:$0xff] }
 0x3c4   : > { %v1119_v17 = vpop.xlane.xlu0 %1118 }
 0x3c5   : > { %v1125_v29 = vadd.f32 %v1119_v17, %v1115_v15 }
 0x3c7   : > { %1128 = vst.msk [vmem:[#allocation3] sm:$0xff] %vm1127_vm8, %v1125_v29  ;;  %vm3726_vm8 = vcmask 261120   ;;  %v3728_v29 = vld [vmem:[#allocation13_spill] sm:$0xff] }
 0x3c8   : > { %vm3750_vm2 = vmmov %vm3726_vm8 }
 0x3ca   : > { %v1124_v33 = vpop.xlane.xlu1 %1123 }
 0x3cb   : > { %v1126_v38 = vadd.f32 %v1124_v33, %v1116_v44 }
 0x3cc   : > { %v1136_v45 = vpop.permute.xlu0 %1135 }
 0x3cd   : > { %1130 = vst.msk [vmem:[#allocation3 + $0x8] sm:$0xf] %vm3725_vm9, %v1126_v38  ;;  %v1143_v21 = vmul.f32 %v1136_v45, %v1131_v5  ;;  %v2614_v38 = vld [vmem:[%s2772_s15] sm:$0xff]  }
 0x3ce   : > { %v1141_v9 = vpop.permute.xlu1 %1140  ;;  %v1748_v5 = vunpack.c.l.bf16 %v2614_v38 }
 0x3cf   : > { %v1144_v28 = vmul.f32 %v1141_v9, %v1132_v61  ;;  %v2615_v9 = vld [vmem:[%s2772_s15 + $0x8] sm:$0xff]  }
 0x3d4   : > { %v1878_v53 = vld [vmem:[#allocation3 + $0x8] sm:$0xf] (!%p2229_p5) }
 0x40f   : > { %v2276_v51 = vpop.f32.mrb[0].mxu1 }
 0x410   : > { %v2277_v19 = vpop.f32.mrb[1].mxu1 }
 0x411   : > { %v2278_v26 = vadd.f32 %v2277_v19, %v2276_v51  ;;  %v2279_v11 = vpop.f32.mrb[2].mxu1  ;;  %v1750_v19 = vunpack.c.l.bf16 %v2615_v9 }
 0x412   : > { %v2280_v10 = vpop.f32.mrb[3].mxu1 }
 0x413   : > { %v1204_v13 = vadd.f32 %v2278_v26, %v1143_v21  ;;  %v2281_v16 = vadd.f32 %v2280_v10, %v2279_v11  ;;  %v3729_v26 = vld [vmem:[#allocation16_spill] sm:$0xff] }
 0x415   : > { %1206 = vst.msk [vmem:[#allocation4] sm:$0xff] %vm3726_vm8, %v1204_v13  ;;  %v1205_v42 = vadd.f32 %v2281_v16, %v1144_v28  ;;  %v1751_v13 = vunpack.c.h.bf16 %v2615_v9 }
 0x417   : > { %1208 = vst.msk [vmem:[#allocation4 + $0x8] sm:$0xf] %vm1207_vm12, %v1205_v42  ;;  %v2366_v6 = vpop.f32.mrb[4].mxu1  ;;  %v3730_v42 = vld [vmem:[#allocation21_spill] sm:$0xff] }
 0x418   : > { %v1514_v7 = vadd.f32 %v2366_v6, %v2911_v8  ;;  %v1385_v50 = vpop.f32.mrb[5].mxu1 }
 0x419   : > { %v1512_v35 = vadd.f32 %v1385_v50, %v2916_v12  ;;  %v2367_v30 = vpop.f32.mrb[6].mxu1 }
 0x41a   : > { %v2191_v48 = vmul.f32 -1.442695, %v1514_v7  ;;  %v1515_v23 = vadd.f32 %v2367_v30, %v2921_v14  ;;  %v1388_v36 = vpop.f32.mrb[7].mxu1  ;;  %v3731_v30 = vld [vmem:[#allocation23_spill] sm:$0xff] }
 0x41b   : > { %v2189_v43 = vmul.f32 -1.442695, %v1512_v35  ;;  %v1513_v52 = vadd.f32 %v1388_v36, %v2926_v18 }
 0x41c   : > { %2486 = vpow2.f32 %v2191_v48  ;;  %v2192_v39 = vmul.f32 -1.442695, %v1515_v23 }
 0x41d   : > { %2488 = vpow2.f32 %v2189_v43  ;;  %v2190_v54 = vmul.f32 -1.442695, %v1513_v52  ;;  %v1749_v43 = vunpack.c.h.bf16 %v2614_v38 }
 0x41e   : > { %2490 = vpow2.f32 %v2192_v39  ;;  %v3732_v39 = vld [vmem:[#allocation29_spill] sm:$0xff] }
 0x41f   : > { %2492 = vpow2.f32 %v2190_v54  ;;  %v2370_v32 = vpop.f32.mrb[8].mxu1 }
 0x420   : > { %v1518_v8 = vadd.f32 %v2370_v32, %v2931_v20  ;;  %v1401_v46 = vpop.f32.mrb[9].mxu1 }
 0x421   : > { %v1516_v12 = vadd.f32 %v1401_v46, %v2936_v24  ;;  %v2371_v41 = vpop.f32.mrb[10].mxu1 }
 0x422   : > { %v2195_v59 = vmul.f32 -1.442695, %v1518_v8  ;;  %v1519_v14 = vadd.f32 %v2371_v41, %v2943_v27  ;;  %v1404_v55 = vpop.f32.mrb[11].mxu1 }
 0x423   : > { %v2193_v56 = vmul.f32 -1.442695, %v1516_v12  ;;  %v1517_v18 = vadd.f32 %v1404_v55, %v2948_v31  ;;  %v2616_v55 = vld [vmem:[%s2772_s15 + $0x10] sm:$0xff]  }
 0x424   : > { %2494 = vpow2.f32 %v2195_v59  ;;  %v2196_v57 = vmul.f32 -1.442695, %v1519_v14 }
 0x425   : > { %2496 = vpow2.f32 %v2193_v56  ;;  %v2194_v58 = vmul.f32 -1.442695, %v1517_v18  ;;  %v1752_v56 = vunpack.c.l.bf16 %v2616_v55 }
 0x426   : > { %v2487_v47 = vpop.eup %2486  ;;  %2498 = vpow2.f32 %v2196_v57 }
 0x427   : > { %v2489_v22 = vpop.eup %2488  ;;  %v1642_v60 = vadd.f32 1.0, %v2487_v47  ;;  %2500 = vpow2.f32 %v2194_v58  ;;  %v2374_v20 = vpop.f32.mrb[12].mxu1  ;;  %v1753_v58 = vunpack.c.h.bf16 %v2616_v55  ;;  %v2617_v47 = vld [vmem:[%s2772_s15 + $0x18] sm:$0xff]  }
 0x428   : > { %v2491_v62 = vpop.eup %2490  ;;  %v1640_v24 = vadd.f32 1.0, %v2489_v22  ;;  %v1522_v63 = vadd.f32 %v2374_v20, %v2955_v34  ;;  %v1417_v0 = vpop.f32.mrb[13].mxu1  ;;  %v1754_v22 = vunpack.c.l.bf16 %v2617_v47 }
 0x429   : > { %v2493_v27 = vpop.eup %2492  ;;  %2502 = vrcp.f32 %v1642_v60  ;;  %v1643_v25 = vadd.f32 1.0, %v2491_v62  ;;  %v1520_v31 = vadd.f32 %v1417_v0, %v2967_v40  ;;  %v2375_v49 = vpop.f32.mrb[14].mxu1 }
 0x42a   : > { %2504 = vrcp.f32 %v1640_v24  ;;  %v1641_v1 = vadd.f32 1.0, %v2493_v27  ;;  %v2199_v2 = vmul.f32 -1.442695, %v1522_v63  ;;  %v1523_v4 = vadd.f32 %v2375_v49, %v3727_v3  ;;  %v1420_v15 = vpop.f32.mrb[15].mxu1  ;;  %v3733_v63 = vld [vmem:[#allocation9_spill] sm:$0xff] }
 0x42b   : > { %2506 = vrcp.f32 %v1643_v25  ;;  %v2197_v17 = vmul.f32 -1.442695, %v1520_v31  ;;  %v1521_v37 = vadd.f32 %v1420_v15, %v3728_v29  ;;  %v1755_v49 = vunpack.c.h.bf16 %v2617_v47 }
 0x42c   : > { %2508 = vrcp.f32 %v1641_v1  ;;  %v2200_v34 = vmul.f32 -1.442695, %v1523_v4 }
 0x42d   : > { %2510 = vpow2.f32 %v2199_v2  ;;  %v2198_v44 = vmul.f32 -1.442695, %v1521_v37  ;;  %v3734_v2 = vld [vmem:[#allocation10_spill] sm:$0xff] }
 0x42e   : > { %v2495_v33 = vpop.eup %2494  ;;  %2512 = vpow2.f32 %v2197_v17 }
 0x42f   : > { %v2497_v40 = vpop.eup %2496  ;;  %v1646_v45 = vadd.f32 1.0, %v2495_v33  ;;  %2514 = vpow2.f32 %v2200_v34  ;;  %v2378_v51 = vpop.f32.mrb[16].mxu1  ;;  %v3735_v34 = vld [vmem:[#allocation12_spill] sm:$0xff] }
 0x430   : > { %v2499_v61 = vpop.eup %2498  ;;  %v1644_v21 = vadd.f32 1.0, %v2497_v40  ;;  %2516 = vpow2.f32 %v2198_v44  ;;  %v1526_v11 = vadd.f32 %v2378_v51, %v3729_v26  ;;  %v1433_v10 = vpop.f32.mrb[17].mxu1 }
 0x431   : > { %v2501_v28 = vpop.eup %2500  ;;  %2518 = vrcp.f32 %v1646_v45  ;;  %v1647_v16 = vadd.f32 1.0, %v2499_v61  ;;  %v1524_v6 = vadd.f32 %v1433_v10, %v3730_v42  ;;  %v2379_v7 = vpop.f32.mrb[18].mxu1  ;;  %v3736_v45 = vld [vmem:[#allocation14_spill] sm:$0xff] }
 0x432   : > { %2520 = vrcp.f32 %v1644_v21  ;;  %v1645_v50 = vadd.f32 1.0, %v2501_v28  ;;  %v2203_v35 = vmul.f32 -1.442695, %v1526_v11  ;;  %v1527_v48 = vadd.f32 %v2379_v7, %v3731_v30  ;;  %v1436_v23 = vpop.f32.mrb[19].mxu1  ;;  %v2618_v28 = vld [vmem:[%s2772_s15 + $0x20] sm:$0xff]  }
 0x433   : > { %v2503_v36 = vpop.eup %2502  ;;  %2522 = vrcp.f32 %v1647_v16  ;;  %v2201_v52 = vmul.f32 -1.442695, %v1524_v6  ;;  %v1525_v54 = vadd.f32 %v1436_v23, %v3732_v39  ;;  %v2619_v6 = vld [vmem:[%s2772_s15 + $0x28] sm:$0xff]  }
 0x434   : > { %v2505_v32 = vpop.eup %2504  ;;  %2524 = vrcp.f32 %v1645_v50  ;;  %v2204_v8 = vmul.f32 -1.442695, %v1527_v48  ;;  %v3460_v46 = vmul.f32 %v2503_v36, %v1750_v19  ;;  %v1758_v7 = vunpack.c.l.bf16 %v2619_v6  ;;  %v3737_v36 = vld [vmem:[#allocation15_spill] sm:$0xff] }
 0x435   : > { %v2507_v12 = vpop.eup %2506  ;;  %2526 = vpow2.f32 %v2203_v35  ;;  %v2202_v41 = vmul.f32 -1.442695, %v1525_v54  ;;  %v3462_v59 = vmul.f32 %v2505_v32, %v1748_v5  ;;  %v1759_v50 = vunpack.c.h.bf16 %v2619_v6 }
 0x436   : > { %v2509_v14 = vpop.eup %2508  ;;  %2528 = vpow2.f32 %v2201_v52  ;;  %v3465_v18 = vmul.f32 %v2507_v12, %v1751_v13  ;;  %v1756_v13 = vunpack.c.l.bf16 %v2618_v28 }
 0x437   : > { %v2511_v57 = vpop.eup %2510  ;;  %2530 = vpow2.f32 %v2204_v8  ;;  %v2382_v60 = vpop.f32.mrb[20].mxu1  ;;  %v3468_v20 = vmul.f32 %v2509_v14, %v1749_v43  ;;  %v3738_v8 = vld [vmem:[#allocation22_spill] sm:$0xff] }
 0x438   : > { %v2513_v62 = vpop.eup %2512  ;;  %v1650_v24 = vadd.f32 1.0, %v2511_v57  ;;  %2532 = vpow2.f32 %v2202_v41  ;;  %v1530_v0 = vadd.f32 %v2382_v60, %v3733_v63  ;;  %v1449_v27 = vpop.f32.mrb[21].mxu1  ;;  %v1813_v25 = vpack.c.bf16 %v3465_v18, %v3460_v46  ;;  %v2627_v46 = vld [vmem:[%s2772_s15 + $0x60] sm:$0xff]  }
 0x439   : > { %v2515_v31 = vpop.eup %2514  ;;  %v1648_v1 = vadd.f32 1.0, %v2513_v62  ;;  %v1528_v3 = vadd.f32 %v1449_v27, %v3734_v2  ;;  %v2383_v4 = vpop.f32.mrb[22].mxu1  ;;  %v1812_v15 = vpack.c.bf16 %v3468_v20, %v3462_v59  ;;  %v1757_v27 = vunpack.c.h.bf16 %v2618_v28 }
 0x43a   : > { %v2517_v17 = vpop.eup %2516  ;;  %2534 = vrcp.f32 %v1650_v24  ;;  %v1651_v29 = vadd.f32 1.0, %v2515_v31  ;;  %v2207_v37 = vmul.f32 -1.442695, %v1530_v0  ;;  %v1531_v44 = vadd.f32 %v2383_v4, %v3735_v34  ;;  %v1452_v33 = vpop.f32.mrb[23].mxu1  ;;  %v3740_v24 = vld [vmem:[#allocation30_spill] sm:$0xff] }
 0x43b   : > { %v2519_v40 = vpop.eup %2518  ;;  %2536 = vrcp.f32 %v1648_v1  ;;  %v1649_v38 = vadd.f32 1.0, %v2517_v17  ;;  %v2205_v5 = vmul.f32 -1.442695, %v1528_v3  ;;  %v1529_v51 = vadd.f32 %v1452_v33, %v3736_v45 }
 0x43c   : > { %v2521_v61 = vpop.eup %2520  ;;  %2538 = vrcp.f32 %v1651_v29  ;;  %v2208_v9 = vmul.f32 -1.442695, %v1531_v44  ;;  %v3478_v19 = vmul.f32 %v2519_v40, %v1754_v22  ;;  %v2620_v29 = vld [vmem:[%s2772_s15 + $0x30] sm:$0xff]   ;;  %v2621_v40 = vld [vmem:[%s2772_s15 + $0x38] sm:$0xff]   ;;  %v1772_v18 = vunpack.c.l.bf16 %v2627_v46 }
 0x43d   : > { %v2523_v21 = vpop.eup %2522  ;;  %2540 = vrcp.f32 %v1649_v38  ;;  %v2206_v26 = vmul.f32 -1.442695, %v1529_v51  ;;  %v3480_v11 = vmul.f32 %v2521_v61, %v1752_v56  ;;  %v1762_v38 = vunpack.c.l.bf16 %v2621_v40 }
 0x43e   : > { %v2525_v10 = vpop.eup %2524  ;;  %2542 = vpow2.f32 %v2207_v37  ;;  %v3483_v16 = vmul.f32 %v2523_v21, %v1755_v49  ;;  %v1760_v37 = vunpack.c.l.bf16 %v2620_v29  ;;  %v1763_v6 = vunpack.c.h.bf16 %v2621_v40 }
 0x43f   : > { %v2527_v42 = vpop.eup %2526  ;;  %2544 = vpow2.f32 %v2205_v5  ;;  %v2386_v35 = vpop.f32.mrb[24].mxu1  ;;  %v3486_v30 = vmul.f32 %v2525_v10, %v1753_v58  ;;  %v3739_v58 = vld [vmem:[#allocation24_spill] sm:$0xff]  ;;  %v3741_v5 = vld [vmem:[#allocation17_spill] sm:$0xff] }
 0x440   : > { %v2529_v48 = vpop.eup %2528  ;;  %v1654_v23 = vadd.f32 1.0, %v2527_v42  ;;  %2546 = vpow2.f32 %v2208_v9  ;;  %v1534_v43 = vadd.f32 %v2386_v35, %v3737_v36  ;;  %v1465_v52 = vpop.f32.mrb[25].mxu1  ;;  %v1815_v39 = vpack.c.bf16 %v3483_v16, %v3478_v19 }
 0x441   : > { %v2531_v54 = vpop.eup %2530  ;;  %v1652_v32 = vadd.f32 1.0, %v2529_v48  ;;  %2548 = vpow2.f32 %v2206_v26  ;;  %v1532_v12 = vadd.f32 %v1465_v52, %v3738_v8  ;;  %v2387_v41 = vpop.f32.mrb[26].mxu1  ;;  %v1814_v14 = vpack.c.bf16 %v3486_v30, %v3480_v11  ;;  %v3742_v26 = vld [vmem:[#allocation18_spill] sm:$0xff] }
 0x442   : > { %v2533_v55 = vpop.eup %2532  ;;  %2550 = vrcp.f32 %v1654_v23  ;;  %v1655_v56 = vadd.f32 1.0, %v2531_v54  ;;  %v2211_v57 = vmul.f32 -1.442695, %v1534_v43  ;;  %v1535_v47 = vadd.f32 %v2387_v41, %v3739_v58  ;;  %v1468_v22 = vpop.f32.mrb[27].mxu1  ;;  %v3744_v54 = vld [vmem:[#allocation20_spill] sm:$0xff] }
 0x443   : > { %2552 = vrcp.f32 %v1652_v32  ;;  %v1653_v60 = vadd.f32 1.0, %v2533_v55  ;;  %v2209_v62 = vmul.f32 -1.442695, %v1532_v12  ;;  %v1533_v63 = vadd.f32 %v1468_v22, %v3740_v24 }
 0x444   : > { %v2535_v0 = vpop.eup %2534  ;;  %2554 = vrcp.f32 %v1655_v56  ;;  %v2212_v31 = vmul.f32 -1.442695, %v1535_v47  ;;  %v1761_v12 = vunpack.c.h.bf16 %v2620_v29 }
 0x445   : > { %v2537_v49 = vpop.eup %2536  ;;  %2556 = vrcp.f32 %v1653_v60  ;;  %v2210_v1 = vmul.f32 -1.442695, %v1533_v63  ;;  %v3496_v2 = vmul.f32 %v2535_v0, %v1758_v7 }
 0x446   : > { %v2539_v3 = vpop.eup %2538  ;;  %2558 = vpow2.f32 %v2211_v57  ;;  %v3498_v4 = vmul.f32 %v2537_v49, %v1756_v13 }
 0x447   : > { %v2541_v17 = vpop.eup %2540  ;;  %2560 = vpow2.f32 %v2209_v62  ;;  %v2390_v34 = vpop.f32.mrb[28].mxu1  ;;  %v3501_v44 = vmul.f32 %v2539_v3, %v1759_v50  ;;  %v3743_v50 = vld [vmem:[#allocation19_spill] sm:$0xff] }
 0x448   : > { %v2543_v33 = vpop.eup %2542  ;;  %2562 = vpow2.f32 %v2212_v31  ;;  %v1538_v45 = vadd.f32 %v2390_v34, %v3741_v5  ;;  %v1481_v51 = vpop.f32.mrb[29].mxu1  ;;  %v3505_v61 = vmul.f32 %v2541_v17, %v1757_v27  ;;  %v3745_v27 = vld [vmem:[#allocation25_spill] sm:$0xff] }
 0x449   : > { %v2545_v9 = vpop.eup %2544  ;;  %v1658_v21 = vadd.f32 1.0, %v2543_v33  ;;  %2564 = vpow2.f32 %v2210_v1  ;;  %v1536_v10 = vadd.f32 %v1481_v51, %v3742_v26  ;;  %v2391_v28 = vpop.f32.mrb[30].mxu1  ;;  %v1817_v13 = vpack.c.bf16 %v3501_v44, %v3496_v2  ;;  %v2622_v1 = vld [vmem:[%s2772_s15 + $0x48] sm:$0xff]   ;;  %v3746_v33 = vld [vmem:[#allocation26_spill] sm:$0xff]  ;;  %v3747_v51 = vld [vmem:[#allocation27_spill] sm:$0xff] }
 0x44a   : > { %v2547_v42 = vpop.eup %2546  ;;  %v1656_v7 = vadd.f32 1.0, %v2545_v9  ;;  %v1539_v35 = vadd.f32 %v2391_v28, %v3743_v50  ;;  %v1484_v48 = vpop.f32.mrb[31].mxu1  ;;  %v1816_v23 = vpack.c.bf16 %v3505_v61, %v3498_v4  ;;  %v2215_v52 = vmul.f32 -1.442695, %v1538_v45 }
 0x44b   : > { %v2549_v36 = vpop.eup %2548  ;;  %2566 = vrcp.f32 %v1658_v21  ;;  %v1659_v43 = vadd.f32 1.0, %v2547_v42  ;;  %v1537_v32 = vadd.f32 %v1484_v48, %v3744_v54  ;;  %v2213_v55 = vmul.f32 -1.442695, %v1536_v10 }
 0x44c   : > { %v2551_v8 = vpop.eup %2550  ;;  %2568 = vrcp.f32 %v1656_v7  ;;  %v1657_v41 = vadd.f32 1.0, %v2549_v36  ;;  %v2216_v57 = vmul.f32 -1.442695, %v1539_v35  ;;  %v1766_v3 = vunpack.c.l.bf16 %v2622_v1 }
 0x44d   : > { %v2553_v56 = vpop.eup %2552  ;;  %2570 = vrcp.f32 %v1659_v43  ;;  %v3514_v58 = vmul.f32 %v2551_v8, %v1762_v38  ;;  %v2214_v22 = vmul.f32 -1.442695, %v1537_v32  ;;  %v1767_v26 = vunpack.c.h.bf16 %v2622_v1 }
 0x44e   : > { %v2555_v47 = vpop.eup %2554  ;;  %2572 = vrcp.f32 %v1657_v41  ;;  %v3516_v60 = vmul.f32 %v2553_v56, %v1760_v37  ;;  %v3749_v4 = vmov 1.0|1.0  }
 0x44f   : > { %v2557_v62 = vpop.eup %2556  ;;  %2574 = vpow2.f32 %v2215_v52  ;;  %v2394_v24 = vpop.f32.mrb[32].mxu1  ;;  %v3518_v63 = vmul.f32 %v2555_v47, %v1763_v6  ;;  %v3748_v6 = vld [vmem:[#allocation28_spill] sm:$0xff]  ;;  %v2623_v52 = vld [vmem:[%s2772_s15 + $0x40] sm:$0xff]  }
 0x450   : > { %v2559_v0 = vpop.eup %2558  ;;  %2576 = vpow2.f32 %v2213_v55  ;;  %v1542_v31 = vadd.f32 %v2394_v24, %v3745_v27  ;;  %v1497_v49 = vpop.f32.mrb[33].mxu1  ;;  %v3522_v17 = vmul.f32 %v2557_v62, %v1761_v12  ;;  %v1764_v54 = vunpack.c.l.bf16 %v2623_v52 }
 0x451   : > { %v2561_v29 = vpop.eup %2560  ;;  %v1662_v34 = vadd.f32 1.0, %v2559_v0  ;;  %2578 = vpow2.f32 %v2216_v57  ;;  %v1540_v37 = vadd.f32 %v1497_v49, %v3746_v33  ;;  %v2395_v40 = vpop.f32.mrb[34].mxu1  ;;  %v1819_v38 = vpack.c.bf16 %v3518_v63, %v3514_v58  ;;  %v2624_v33 = vld [vmem:[%s2772_s15 + $0x58] sm:$0xff]   ;;  %v1877_v58 = vld [vmem:[#allocation3] sm:$0xff] (!%p2229_p5) }
 0x452   : > { %v2563_v5 = vpop.eup %2562  ;;  %v1660_v45 = vadd.f32 1.0, %v2561_v29  ;;  %2580 = vpow2.f32 %v2214_v22  ;;  %v1543_v9 = vadd.f32 %v2395_v40, %v3747_v51  ;;  %v1500_v21 = vpop.f32.mrb[35].mxu1  ;;  %v2219_v42 = vmul.f32 -1.442695, %v1542_v31 }
 0x453   : > { %v2565_v10 = vpop.eup %2564  ;;  %2582 = vrcp.f32 %v1662_v34  ;;  %v1663_v28 = vadd.f32 1.0, %v2563_v5  ;;  %v1541_v7 = vadd.f32 %v1500_v21, %v3748_v6  ;;  %v2217_v35 = vmul.f32 -1.442695, %v1540_v37 }
 0x454   : > { %2584 = vrcp.f32 %v1660_v45  ;;  %v1661_v50 = vadd.f32 1.0, %v2565_v10  ;;  %v1818_v48 = vpack.c.bf16 %v3522_v17, %v3516_v60  ;;  %v2220_v43 = vmul.f32 -1.442695, %v1543_v9  ;;  %v2625_v45 = vld [vmem:[%s2772_s15 + $0x50] sm:$0xff]  }
 0x455   : > { %v2567_v36 = vpop.eup %2566  ;;  %2586 = vrcp.f32 %v1663_v28  ;;  %v1765_v32 = vunpack.c.h.bf16 %v2623_v52  ;;  %v2218_v12 = vmul.f32 -1.442695, %v1541_v7  ;;  %v1770_v37 = vunpack.c.l.bf16 %v2624_v33 }
 0x456   : > { %v2569_v8 = vpop.eup %2568  ;;  %2588 = vrcp.f32 %v1661_v50  ;;  %v1798_v56 = vmul.f32 %v2567_v36, %v1766_v3  ;;  %v1771_v3 = vunpack.c.h.bf16 %v2624_v33  ;;  %v1768_v51 = vunpack.c.l.bf16 %v2625_v45 }
 0x457   : > { %v2571_v41 = vpop.eup %2570  ;;  %2590 = vpow2.f32 %v2219_v42  ;;  %v1796_v22 = vmul.f32 %v2569_v8, %v1764_v54  ;;  %v1769_v9 = vunpack.c.h.bf16 %v2625_v45  ;;  %v2626_v8 = vld [vmem:[%s2772_s15 + $0x68] sm:$0xff]   ;;  %v2700_v17 = vmov (!%p2229_p5), 0  }
 0x458   : > { %v2573_v55 = vpop.eup %2572  ;;  %2592 = vpow2.f32 %v2217_v35  ;;  %v1799_v57 = vmul.f32 %v2571_v41, %v1767_v26  ;;  %v1775_v41 = vunpack.c.h.bf16 %v2626_v8  ;;  %2630 = vset.pattern.permute.xlu0 (!%p2229_p5), %v2700_v17 }
 0x459   : > { %v2575_v47 = vpop.eup %2574  ;;  %2594 = vpow2.f32 %v2220_v43  ;;  %v1797_v62 = vmul.f32 %v2573_v55, %v1765_v32 }
 0x45a   : > { %v2577_v24 = vpop.eup %2576  ;;  %v1666_v0 = vadd.f32 1.0, %v2575_v47  ;;  %2596 = vpow2.f32 %v2218_v12  ;;  %v1821_v27 = vpack.c.bf16 %v1799_v57, %v1798_v56  ;;  %v1774_v12 = vunpack.c.l.bf16 %v2626_v8 }
 0x45b   : > { %v2579_v31 = vpop.eup %2578  ;;  %v1664_v49 = vadd.f32 1.0, %v2577_v24  ;;  %v1820_v1 = vpack.c.bf16 %v1797_v62, %v1796_v22 }
 0x45c   : > { %v2581_v29 = vpop.eup %2580  ;;  %2598 = vrcp.f32 %v1666_v0  ;;  %v1667_v34 = vadd.f32 1.0, %v2579_v31 }
 0x45d   : > { %v2583_v40 = vpop.eup %2582  ;;  %2600 = vrcp.f32 %v1664_v49  ;;  %v1665_v5 = vadd.f32 1.0, %v2581_v29  ;;  %2299 = vmatprep.subr.bf16.mxu0 %v1820_v1  ;;  %v2629_v1 = vld [vmem:[%s2772_s15 + $0x70] sm:$0xff]  }
 0x45e   : > { %v2585_v21 = vpop.eup %2584  ;;  %2602 = vrcp.f32 %v1667_v34  ;;  %2300 = vmatpush3.bf16.msra.mxu0 %v1812_v15  ;;  %v1802_v28 = vmul.f32 %v2583_v40, %v1770_v37  ;;  %v1776_v29 = vunpack.c.l.bf16 %v2629_v1  ;;  %v1777_v34 = vunpack.c.h.bf16 %v2629_v1 }
 0x45f   : > { %v2587_v26 = vpop.eup %2586  ;;  %2604 = vrcp.f32 %v1665_v5  ;;  %2301 = vmatprep.subr.bf16.mxu0 %v1821_v27  ;;  %v1800_v7 = vmul.f32 %v2585_v21, %v1768_v51  ;;  %v1737_v51 = vld [vmem:[#allocation5 + $0x8] sm:$0xf] }
 0x460   : > { %v2589_v10 = vpop.eup %2588  ;;  %v1803_v42 = vmul.f32 %v2587_v26, %v1771_v3 }
 0x461   : > { %v2591_v6 = vpop.eup %2590  ;;  %v1801_v50 = vmul.f32 %v2589_v10, %v1769_v9 }
 0x462   : > { %v2593_v35 = vpop.eup %2592  ;;  %v1670_v36 = vadd.f32 1.0, %v2591_v6  ;;  %2302 = vmatpush3.bf16.msra.mxu0 %v1813_v25  ;;  %v1823_v43 = vpack.c.bf16 %v1803_v42, %v1802_v28  ;;  %v1773_v25 = vunpack.c.h.bf16 %v2627_v46  ;;  %v2636_v42 = vld [vmem:[%s3625_s6] sm:$0xff] (!%p2229_p5)   ;;  %v2701_v6 = vmov (!%p2229_p5), 0.0  }
 0x463   : > { %v2595_v59 = vpop.eup %2594  ;;  %v1668_v20 = vadd.f32 1.0, %v2593_v35  ;;  %v1822_v15 = vpack.c.bf16 %v1801_v50, %v1800_v7  ;;  %v2637_v7 = vld [vmem:[%s3625_s6 + $0x8] sm:$0xff] (!%p2229_p5)   ;;  %v2638_v35 = vld [vmem:[%s3625_s6 + $0x10] sm:$0xff] (!%p2229_p5)  }
 0x464   : > { %v2597_v52 = vpop.eup %2596  ;;  %2606 = vrcp.f32 %v1670_v36  ;;  %v1671_v54 = vadd.f32 1.0, %v2595_v59 }
 0x465   : > { %2608 = vrcp.f32 %v1668_v20  ;;  %v1669_v32 = vadd.f32 1.0, %v2597_v52  ;;  %2303 = vmatprep.subr.bf16.mxu0 %v1822_v15  ;;  %v1883_v20 = vld [vmem:[#allocation4] sm:$0xff] (!%p2229_p5)  ;;  %v1884_v52 = vld [vmem:[#allocation4 + $0x8] sm:$0xf] (!%p2229_p5) }
 0x466   : > { %v2599_v55 = vpop.eup %2598  ;;  %2610 = vrcp.f32 %v1671_v54  ;;  %2304 = vmatpush3.bf16.msra.mxu0 %v1814_v14  ;;  %v2628_v14 = vld [vmem:[%s2772_s15 + $0x78] sm:$0xff]  }
 0x467   : > { %v2601_v56 = vpop.eup %2600  ;;  %2612 = vrcp.f32 %v1669_v32  ;;  %2305 = vmatprep.subr.bf16.mxu0 %v1823_v43  ;;  %v1806_v22 = vmul.f32 %v2599_v55, %v1774_v12  ;;  %v1778_v27 = vunpack.c.l.bf16 %v2628_v14  ;;  %v1779_v31 = vunpack.c.h.bf16 %v2628_v14  ;;  %v2639_v43 = vld [vmem:[%s3625_s6 + $0x18] sm:$0xff] (!%p2229_p5)  }
 0x468   : > { %v2603_v57 = vpop.eup %2602  ;;  %v1804_v24 = vmul.f32 %v2601_v56, %v1772_v18 }
 0x469   : > { %v2605_v47 = vpop.eup %2604  ;;  %v1807_v62 = vmul.f32 %v2603_v57, %v1775_v41  ;;  %v1994_v57 = vld [vmem:[%s3622_s3] sm:$0xff] (!%p2229_p5) }
 0x46a   : > { %2306 = vmatpush3.bf16.msra.mxu0 %v1815_v39  ;;  %v1805_v0 = vmul.f32 %v2605_v47, %v1773_v25  ;;  %v2230_v25 = vld [vmem:[%s3626_s7] ss:$0 sm:$0xff] (!%p2229_p5) }
 0x46b   : > { %v1825_v11 = vpack.c.bf16 %v1807_v62, %v1806_v22 }
 0x46c   : > { %v1824_v30 = vpack.c.bf16 %v1805_v0, %v1804_v24  ;;  %v1995_v24 = vld [vmem:[%s3622_s3 + $0x8] sm:$0xf] (!%p2229_p5) }
 0x46e   : > { %v2607_v49 = vpop.eup %2606  ;;  %2307 = vmatprep.subr.bf16.mxu0 %v1824_v30 }
 0x46f   : > { %v2609_v33 = vpop.eup %2608  ;;  %2308 = vmatpush3.bf16.msra.mxu0 %v1816_v23  ;;  %v1810_v16 = vmul.f32 %v2607_v49, %v1778_v27  ;;  %v1736_v23 = vld [vmem:[#allocation5] sm:$0xff] }
 0x470   : > { %v2611_v37 = vpop.eup %2610  ;;  %2309 = vmatprep.subr.bf16.mxu0 %v1825_v11  ;;  %v1808_v3 = vmul.f32 %v2609_v33, %v1776_v29 }
 0x471   : > { %v2613_v19 = vpop.eup %2612  ;;  %v1811_v39 = vmul.f32 %v2611_v37, %v1779_v31 }
 0x472   : > { %v1809_v40 = vmul.f32 %v2613_v19, %v1777_v34 }
 0x473   : > { %2310 = vmatpush3.bf16.msra.mxu0 %v1817_v13  ;;  %v1827_v5 = vpack.c.bf16 %v1811_v39, %v1810_v16 }
 0x474   : > { %v1826_v45 = vpack.c.bf16 %v1809_v40, %v1808_v3 }
 0x476   : > { %2311 = vmatprep.subr.bf16.mxu0 %v1826_v45 }
 0x477   : > { %2312 = vmatpush3.bf16.msra.mxu0 %v1818_v48  ;;  %v1880_v48 = vmax.f32 (!%p2229_p5), %v1878_v53, 1e-30 }
 0x478   : > { %2313 = vmatprep.subr.bf16.mxu0 %v1827_v5 }
 0x47b   : > { %2314 = vmatpush3.bf16.msra.mxu0 %v1819_v38  ;;  %v1879_v38 = vmax.f32 (!%p2229_p5), %v1877_v58, 1e-30 }
 0x47c   : > { %2396 = vmatprep.subr.bf16.mxu0 (!%p2229_p5), %v2701_v6 }
 0x47d   : > { %2640 = vrcp.f32 (!%p2229_p5), %v1879_v38 }
 0x47e   : > { %2228 = vmatmul.mubr.msk.bf16.vlgmr.msra.gmra.mrb[32].mxu0 %vm3296_vm13, %v3749_v4  ;;  %2642 = vrcp.f32 (!%p2229_p5), %v1880_v48  ;;  %vm2703_vm13 = vmmov (!%p2229_p5), 0  }
 0x47f   : > { %2397 = vmatpush3.bf16.msra.mxu0 (!%p2229_p5), %v2636_v42  ;;  %2404 = vmatprep.mubr.msk.bf16.mxu0 (!%p2229_p5), %vm2703_vm13, %v2701_v6 }
 0x480   : > { %2398 = vmatprep.subr.bf16.mxu0 (!%p2229_p5), %v2701_v6 }
 0x483   : > { %2399 = vmatpush3.bf16.msra.mxu0 (!%p2229_p5), %v2637_v7 }
 0x484   : > { %2400 = vmatprep.subr.bf16.mxu0 (!%p2229_p5), %v2701_v6 }
 0x487   : > { %v2641_v50 = vpop.eup (!%p2229_p5), %2640  ;;  %2401 = vmatpush3.bf16.msra.mxu0 (!%p2229_p5), %v2638_v35 }
 0x488   : > { %1887 = vperm.xlu0 (!%p2229_p5), %2630, %v2641_v50   ;;  %v2643_v36 = vpop.eup (!%p2229_p5), %2642  ;;  %2402 = vmatprep.subr.bf16.mxu0 (!%p2229_p5), %v2701_v6 }
 0x48b   : > { %2403 = vmatpush3.bf16.msra.mxu0 (!%p2229_p5), %v2639_v43 }
 0x48c   : > { %1892 = vperm.xlu0 (!%p2229_p5), %2630, %v2643_v36  }
 0x507   : > { %v1888_v15 = vpop.permute.xlu0 (!%p2229_p5), %1887 }
 0x508   : > { %v1895_v8 = vmul.f32 (!%p2229_p5), %v1888_v15, %v1883_v20 }
 0x50b   : > { %v1893_v12 = vpop.permute.xlu0 (!%p2229_p5), %1892 }
 0x50c   : > { %v1896_v41 = vmul.f32 (!%p2229_p5), %v1893_v12, %v1884_v52 }
 0x551   : > { %v2315_v61 = vpop.f32.mrb[32].mxu0 }
 0x552   : > { %v2316_v2 = vpop.f32.mrb[33].mxu0 }
 0x553   : > { %v2317_v44 = vadd.f32 %v2316_v2, %v2315_v61  ;;  %v2318_v13 = vpop.f32.mrb[34].mxu0  ;;  %1876 = sbr.rel (%p2229_p5) target bundleno = 1848 (0x738), region = 60 }
 0x554   : > { %v2319_v9 = vpop.f32.mrb[35].mxu0 }
 0x555   : > { %v1869_v21 = vadd.f32 %v2317_v44, %v1736_v23  ;;  %v2320_v26 = vadd.f32 %v2319_v9, %v2318_v13 }
 0x557   : > { %1871 = vst.msk [vmem:[#allocation5] sm:$0xff] %vm3750_vm2, %v1869_v21  ;;  %v1870_v60 = vadd.f32 %v2320_v26, %v1737_v51 }
 0x559   : > { %1872 = vst.msk [vmem:[#allocation5 + $0x8] sm:$0xf] %vm1207_vm12, %v1870_v60 }
 0x55e   : > { %v1897_v63 = vld [vmem:[#allocation5] sm:$0xff] }
 0x560   : > { %v1898_v10 = vld [vmem:[#allocation5 + $0x8] sm:$0xf] }
 0x561   : > { %v2631_v28 = vpack.i.bf16 %v1898_v10, %v1897_v63 }
 0x563   : > { %2632 = vrot.lane.b32.xlu1 %v2631_v28, %s2702_s29 }
 0x5d5   : > { %v2633_v59 = vpop.permute.xlu1 %2632 }
 0x5d6   : > { %v2635_v54 = vunpack.i.h.bf16 %v2633_v59  ;;  %v2634_v32 = vunpack.i.l.bf16 %v2633_v59 }
 0x5d8   : > { %v1907_v55 = vsel %vm3751_vm3, %v1895_v8, %v2634_v32  ;;  %v1908_v46 = vsel %vm3752_vm10, %v1896_v41, %v2635_v54 }
 0x5d9   : > { %v1909_v18 = vpack.c.bf16 %v1908_v46, %v1907_v55 }
 0x5db   : > { %2405 = vmatmul.mubr.msk.bf16.vlgmr.msra.gmra.mrb[0].mxu0 %vm1949_vm11, %v1909_v18 }
 0x6ae   : > { %v1987_v56 = vpop.f32.mrb[0].mxu0 }
 0x6af   : > { %v1988_v47 = vadd.f32 %v2230_v25, %v1987_v56  ;;  %v2406_v22 = vpop.f32.mrb[1].mxu0 }
 0x6b0   : > { %v1990_v62 = vpop.f32.mrb[2].mxu0 }
 0x6b1   : > { %v1996_v0 = vadd.f32 %v1994_v57, %v1988_v47  ;;  %v1991_v11 = vadd.f32 %v2230_v25, %v1990_v62  ;;  %v2407_v30 = vpop.f32.mrb[3].mxu0 }
 0x6b3   : > { %2644 = vtanh.f32 %v1996_v0  ;;  %v1997_v14 = vadd.f32 %v1995_v24, %v1991_v11  ;;  %v2236_v49 = vmul.f32 -1.442695, %v1996_v0 }
 0x6b5   : > { %2646 = vtanh.f32 %v1997_v14  ;;  %v2237_v1 = vmul.f32 -1.442695, %v1997_v14 }
 0x6b6   : > { %2648 = vpow2.f32 %v2236_v49 }
 0x6b7   : > { %2650 = vpow2.f32 %v2237_v1 }
 0x6bd   : > { %v2645_v27 = vpop.eup %2644 }
 0x6be   : > { %2018 = vrot.lane.b32.xlu1 %v2645_v27, %s2704_s20 }
 0x6bf   : > { %v2647_v31 = vpop.eup %2646 }
 0x6c0   : > { %2020 = vrot.lane.b32.xlu0 %v2647_v31, %s2704_s20  ;;  %v2649_v29 = vpop.eup %2648 }
 0x6c1   : > { %v2651_v34 = vpop.eup %2650  ;;  %v2004_v33 = vadd.f32 1.0, %v2649_v29 }
 0x6c2   : > { %v2005_v37 = vadd.f32 1.0, %v2651_v34 }
 0x6c3   : > { %2652 = vrcp.f32 %v2004_v33 }
 0x6c4   : > { %2654 = vrcp.f32 %v2005_v37 }
 0x6cd   : > { %v2653_v19 = vpop.eup %2652 }
 0x6ce   : > { %v2655_v16 = vpop.eup %2654  ;;  %v2012_v39 = vsub.f32 1.0, %v2653_v19 }
 0x6cf   : > { %v2013_v40 = vsub.f32 1.0, %v2655_v16 }
 0x6d0   : > { %v2014_v5 = vmul.f32 %v2012_v39, %v1895_v8 }
 0x6d1   : > { %v2015_v23 = vmul.f32 %v2013_v40, %v1896_v41 }
 0x730   : > { %v2019_v3 = vpop.permute.xlu1 %2018 }
 0x731   : > { %v2024_v45 = vmul.f32 %v2653_v19, %v2019_v3 }
 0x732   : > { %v2021_v61 = vpop.permute.xlu0 %2020 }
 0x733   : > { %v2026_v4 = vadd.f32 %v2024_v45, %v2014_v5  ;;  %v2025_v2 = vmul.f32 %v2655_v16, %v2021_v61 }
 0x735   : > { %2028 = vst.msk [vmem:[#allocation6] sm:$0xff] %vm3753_vm14, %v2026_v4  ;;  %v2027_v44 = vadd.f32 %v2025_v2, %v2015_v23 }
 0x737   : > { %2029 = vst.msk [vmem:[#allocation6 + $0x8] sm:$0xf] %vm1207_vm12, %v2027_v44 }
 0x738 PF: > { %p2413_p6 = scmp.eq.s32.totalorder %s2759_s28, 1  ;;  %s2705_s21 = smov [#allocation6]  }
 0x739   : > { %s2036_s22 = sshll.u32 %s2705_s21, 4  ;;  %s2037_s22 = int_to_ptr.vmem [resolvable:$true] %s2036_s22 }
 0x73a   : > { %s2656_s23 = scalar_lea.vmem %s2037_s22, 256  ;;  %p2663_p10 = scmp.lt.s32.totalorder %s2037_s22, %s2037_s22 }
 0x73b   : > { %p2657_p7 = scmp.ne.s32.totalorder %s2037_s22, %s2656_s23  ;;  %p2664_p11 = scmp.lt.s32.totalorder %s2656_s23, %s2656_s23 }
 0x73d   : > { %p2658_p8 = pnand %p2657_p7, %p2413_p6  ;;  %p2665_p12 = por %p2664_p11, %p2663_p10 }
 0x73f   : > { %p2659_p9 = pneg %p2658_p8 }
 0x741   : > { %p2666_p13 = pnand %p2665_p12, %p2659_p9 }
 0x743   : > { %2669 = shalt.err (!%p2666_p13)
}
 0x744   : > { %s2670_s26 = scalar_lea.hbm %s3627_s8, 256 }
 0x745   : > { %p2671_p0 = scmp.ne.s32.totalorder %s3627_s8, %s2670_s26  ;;  %p2676_p3 = scmp.lt.u32.totalorder %s2670_s26, %s3627_s8 }
 0x747   : > { %p2672_p1 = pnand %p2671_p0, %p2413_p6 }
 0x749   : > { %p2673_p2 = pneg %p2672_p1 }
 0x74b   : > { %p2678_p4 = pnand %p2676_p3, %p2673_p2 }
 0x74d   : > { %2681 = shalt.err (!%p2678_p4)
}
 0x74e   : > { %s2706_s11 = smov 128   ;;  %s2707_s12 = smov 8  }
 0x74f   : > { %2410 = dma.vmem_to_hbm [thread:$0]  (%p2413_p6), %s2037_s22, 256, %s3627_s8, [#allocation7], %s2706_s11, %s2706_s11, %s2707_s12  }
 0x750   : > { %2687 = dma.done.wait (%p2413_p6), [#allocation7], 256  }
 0x751   : > { %2689 = vsyncadd (%p2413_p6), [#allocation7], 4294967040 }
 0x752 PF: > { %s19_s27 = sadd.s32 1, %s2692_s27  }
 0x753   : > { %p16_p5 = scmp.ge.s32.totalorder %s19_s27, 4  }
 0x755   :  { %18 = sbr.rel (!%p16_p5) target bundleno = 1 (0x1), region = 90 }
 0x75c   :  { %2052 = vsyncpa [#allocation7], 1 }
 0x75d   :  { %2054 = vsyncpa [#allocation7 + $0x1], 1 }

</bundles_post_ra>
